<compile_context>
chip_gen: v7x
topology: tpu7x:2x2x1
jax: 0.10.0
libtpu: 0.0.40
codegen_flags: <defaults>
</compile_context>

<pallas_src>
import functools

import jax
import jax.numpy as jnp
import numpy as np
from jax import lax
from jax.experimental import pallas as pl
from jax.experimental.pallas import tpu as pltpu

_MASK = float(np.finfo(np.float32).min)   # finite fp32 "minus infinity" for masking


def _round_up(x, m):
    return ((x + m - 1) // m) * m


def _ntxent_kernel(xr_ref, xc_ref, out_ref, m_ref, l_ref, *,
                   batch, b_pad, tm, tn, has_pad):
    i = pl.program_id(0)          # row tile (parallel)
    j = pl.program_id(1)          # column tile (online-LSE reduction axis)
    r0 = i * tm
    c0 = j * tn

    @pl.when(j == 0)
    def _init():
        m_ref[...] = jnp.full((tm, 1), -jnp.inf, jnp.float32)
        l_ref[...] = jnp.zeros((tm, 1), jnp.float32)

    # (TM, TN) logits tile straight off the MXU: the operands already carry the
    # cosine normalisation and the sqrt(1/T) scale (folded in the wrapper), so
    # no per-tile divide / scale pass is needed here.
    z = lax.dot_general(xr_ref[...], xc_ref[...],
                        (((1,), (1,)), ((), ())),
                        preferred_element_type=jnp.float32)          # (TM, TN) f32

    def _lse_update(zt):
        m_prev = m_ref[...]
        m_new = jnp.maximum(m_prev, jnp.max(zt, axis=1, keepdims=True))
        alpha = jnp.exp(m_prev - m_new)
        l_ref[...] = alpha * l_ref[...] + jnp.sum(jnp.exp(zt - m_new), axis=1,
                                                  keepdims=True)
        m_ref[...] = m_new

    # Masking is only needed on tiles intersecting the self-similarity diagonal
    # and/or the zero-padded column ranges [batch, b_pad) & [b_pad+batch, n_pad).
    # Gate it so the vast majority of tiles skip the compare/select passes.
    diag_hit = (r0 < c0 + tn) & (c0 < r0 + tm)
    if has_pad:
        pad_hit = ((c0 < b_pad) & (c0 + tn > batch)) | (c0 + tn > b_pad + batch)
        needs_mask = diag_hit | pad_hit
    else:
        needs_mask = diag_hit

    @pl.when(needs_mask)
    def _masked():
        row_g = lax.broadcasted_iota(jnp.int32, (tm, 1), 0) + r0
        col_g = lax.broadcasted_iota(jnp.int32, (1, tn), 1) + c0
        invalid = row_g == col_g
        if has_pad:
            invalid = invalid | jnp.logical_not(
                (col_g < batch) | ((col_g >= b_pad) & (col_g < b_pad + batch)))
        # NOTE: _MASK is finite on purpose.  A transiently fully-masked tile
        # contributes l = sum(exp(0)) at m = _MASK; the first tile with a real
        # column flushes it via alpha = exp(_MASK - real_max) == 0.
        _lse_update(jnp.where(invalid, _MASK, z))

    @pl.when(jnp.logical_not(needs_mask))
    def _unmasked():
        _lse_update(z)

    @pl.when(j == pl.num_programs(1) - 1)
    def _finalize():
        # per-row log-sum-exp over all non-self valid columns (positive + negatives)
        out_ref[...] = m_ref[...] + jnp.log(l_ref[...])


def ntxent_loss(zis, zjs, *, temperature, use_cosine_similarity,
                compute_dtype=jnp.bfloat16):
    """NT-Xent loss. zis, zjs: (B, D). Returns scalar float32."""
    b, d = zis.shape
    assert zjs.shape == (b, d)
    inv_t = 1.0 / float(temperature)

    # ---- generation-aware static tiling ------------------------------------
    itemsize = jnp.dtype(compute_dtype).itemsize
    d_pad = _round_up(d, 128)

    try:
        vmem_cap = int(pltpu.get_tpu_info().vmem_capacity_bytes)
    except Exception:
        vmem_cap = 64 * 1024 * 1024          # assume smallest (v7x per-core)
    vmem_budget = int(0.6 * vmem_cap)

    def _blocks_bytes(tm_, tn_):
        # double-buffered row + column blocks, output block, m/l scratch, slack
        return (2 * (tm_ + tn_) * d_pad * itemsize
                + 2 * tm_ * 4 + 2 * tm_ * 4 + (1 << 20))

    row_cap = _round_up(b, 128)              # don't pad rows past the next 128
    tm = min(1024 if d_pad <= 256 else 512, row_cap)
    while tm > 128 and _blocks_bytes(tm, 128) > vmem_budget:
        tm -= 128
    b_pad = _round_up(b, tm)
    n_pad = 2 * b_pad
    tn = 128
    for cand in (512, 256, 128):
        if n_pad % cand == 0 and _blocks_bytes(tm, cand) <= vmem_budget:
            tn = cand
            break
    nrt = n_pad // tm
    nct = n_pad // tn

    # ---- operand prep (O(N*D), runs as plain XLA ops) -----------------------
    zjs32 = zjs.astype(jnp.float32)
    zis32 = zis.astype(jnp.float32)

    # Positive logits (each pair appears in two rows); computed here in f32
    # with the exact torch CosineSimilarity clamp, subtracted after the kernel.
    pos_dot = jnp.sum(zjs32 * zis32, axis=1)                       # (B,)
    if use_cosine_similarity:
        nj = jnp.sqrt(jnp.sum(zjs32 * zjs32, axis=1))
        ni = jnp.sqrt(jnp.sum(zis32 * zis32, axis=1))
        pos_sim = pos_dot / jnp.maximum(nj * ni, 1e-8)
    else:
        pos_sim = pos_dot
    pos_total = 2.0 * jnp.sum(pos_sim) * inv_t

    def pad_half(x):
        return jnp.pad(x, ((0, b_pad - b), (0, d_pad - d)))

    reps32 = jnp.concatenate([pad_half(zjs32), pad_half(zis32)], axis=0)  # (N_pad, D_pad)
    if use_cosine_similarity:
        # Fold cosine normalisation and sqrt(1/T) into the operands.  Per-row
        # clamping differs from torch's max(||x||*||y||, 1e-8) only for
        # near-zero-norm rows.
        norms = jnp.sqrt(jnp.sum(reps32 * reps32, axis=1, keepdims=True))
        scale = np.sqrt(inv_t) / jnp.maximum(norms, 1e-6)
    else:
        scale = np.sqrt(inv_t)                # folded 1/T for the dot path
    reps_c = (reps32 * scale).astype(compute_dtype)

    kernel = functools.partial(
        _ntxent_kernel,
        batch=int(b), b_pad=int(b_pad), tm=int(tm), tn=int(tn),
        has_pad=bool(b_pad != b))

    cost = pl.CostEstimate(
        flops=2 * n_pad * n_pad * d_pad,
        transcendentals=n_pad * n_pad,
        bytes_accessed=(1 + nrt) * n_pad * d_pad * itemsize + 4 * n_pad)

    grid_spec = pltpu.PrefetchScalarGridSpec(
        num_scalar_prefetch=0,
        grid=(nrt, nct),
        in_specs=[
            # row block (resident across the whole column sweep)
            pl.BlockSpec((tm, d_pad), lambda i, j: (i, 0)),
            # column block (the only operand re-streamed every j step)
            pl.BlockSpec((tn, d_pad), lambda i, j: (j, 0)),
        ],
        out_specs=pl.BlockSpec((tm, 1), lambda i, j: (i, 0)),
        scratch_shapes=[
            pltpu.VMEM((tm, 1), jnp.float32),   # running max m
            pltpu.VMEM((tm, 1), jnp.float32),   # running sum-of-exp l
        ],
    )

    lse = pl.pallas_call(
        kernel,
        out_shape=jax.ShapeDtypeStruct((n_pad, 1), jnp.float32),
        grid_spec=grid_spec,
        compiler_params=pltpu.CompilerParams(
            dimension_semantics=("parallel", "arbitrary"),
            vmem_limit_bytes=int(vmem_budget)),
        cost_estimate=cost,
    )(reps_c, reps_c)

    # tiny final reduction over the 2B valid rows; padded rows are excluded.
    total = jnp.sum(lse[:b, 0]) + jnp.sum(lse[b_pad:b_pad + b, 0]) - pos_total
    return total / (2 * b)


def _reference_loss(zis, zjs, temperature, use_cosine, batch_size):
    """Pure NumPy re-implementation of the PyTorch forward (for validation)."""
    zis = np.asarray(zis, np.float32)
    zjs = np.asarray(zjs, np.float32)
    reps = np.concatenate([zjs, zis], axis=0)
    if use_cosine:
        nrm = np.linalg.norm(reps, axis=1, keepdims=True)
        sim = (reps @ reps.T) / np.maximum(nrm * nrm.T, 1e-8)
    else:
        sim = reps @ reps.T
    bsz = batch_size
    nn = 2 * bsz
    l_pos = np.diagonal(sim, bsz)
    r_pos = np.diagonal(sim, -bsz)
    positives = np.concatenate([l_pos, r_pos]).reshape(nn, 1)
    mask = (1 - (np.eye(nn) + np.eye(nn, k=-bsz) + np.eye(nn, k=bsz))).astype(bool)
    negatives = sim[mask].reshape(nn, -1)
    logits = np.concatenate([positives, negatives], axis=1) / temperature
    m = logits.max(axis=1, keepdims=True)
    lse = m[:, 0] + np.log(np.exp(logits - m).sum(axis=1))
    loss = np.sum(lse - logits[:, 0])          # CE(label=0), reduction='sum'
    return np.float32(loss / nn)


if __name__ == "__main__":
    batch_size = 8
    hidden = 32
    temperature = 0.5

    key = jax.random.PRNGKey(0)
    k1, k2, k3, k4 = jax.random.split(key, 4)
    zis = jax.random.normal(k1, (batch_size, hidden), dtype=jnp.float32)
    zjs = jax.random.normal(k2, (batch_size, hidden), dtype=jnp.float32)

    # strict f32-compute checks (cosine + dot similarity)
    for use_cos in (True, False):
        out = jax.block_until_ready(
            ntxent_loss(zis, zjs, temperature=temperature,
                        use_cosine_similarity=use_cos,
                        compute_dtype=jnp.float32))
        ref = _reference_loss(zis, zjs, temperature, use_cos, batch_size)
        assert np.allclose(np.asarray(out), ref, rtol=1e-3, atol=1e-3), \
            (use_cos, out, ref)

    # default bf16-MXU performance path (looser tolerance)
    for use_cos in (True, False):
        out = jax.block_until_ready(
            ntxent_loss(zis, zjs, temperature=temperature,
                        use_cosine_similarity=use_cos))
        ref = _reference_loss(zis, zjs, temperature, use_cos, batch_size)
        assert np.allclose(np.asarray(out), ref, rtol=1e-2, atol=1e-2), \
            (use_cos, out, ref)

    # ragged case exercising row / column / feature padding + gated masking
    b2, d2 = 6, 20
    zis2 = jax.random.normal(k3, (b2, d2), dtype=jnp.float32)
    zjs2 = jax.random.normal(k4, (b2, d2), dtype=jnp.float32)
    out2 = jax.block_until_ready(
        ntxent_loss(zis2, zjs2, temperature=temperature,
                    use_cosine_similarity=True, compute_dtype=jnp.float32))
    ref2 = _reference_loss(zis2, zjs2, temperature, True, b2)
    assert np.allclose(np.asarray(out2), ref2, rtol=1e-3, atol=1e-3), (out2, ref2)

    print("KERNEL_OK")
</pallas_src>

<mosaic_0001>
module attributes {stable_mosaic.version = 11 : i64} {
  func.func @_ntxent_kernel(%arg0: i32, %arg1: i32, %arg2: memref<128x128xf32, #tpu.memory_space<vmem>>, %arg3: memref<256x128xf32, #tpu.memory_space<vmem>>, %arg4: memref<128x1xf32, #tpu.memory_space<vmem>>, %arg5: memref<128x1xf32, #tpu.memory_space<vmem>>, %arg6: memref<128x1xf32, #tpu.memory_space<vmem>>) attributes {dimension_semantics = [#tpu.dimension_semantics<parallel>, #tpu.dimension_semantics<arbitrary>], iteration_bounds = array<i64: 2, 1>, scalar_prefetch = 0 : i64, scratch_operands = 2 : i64, tpu.core_type = #tpu.core_type<tc>, window_params = [{transform_indices = @transform_0, window_bounds = array<i64: 128, 128>}, {transform_indices = @transform_1, window_bounds = array<i64: 256, 128>}, {transform_indices = @transform_2, window_bounds = array<i64: 128, 1>}]} {
    %c128_i32 = arith.constant 128 : i32
    %0 = arith.muli %arg0, %c128_i32 : i32
    %c256_i32 = arith.constant 256 : i32
    %1 = arith.muli %arg1, %c256_i32 : i32
    %c0_i32 = arith.constant 0 : i32
    %2 = arith.cmpi eq, %arg1, %c0_i32 : i32
    %3 = arith.extui %2 : i1 to i32
    %c0_i32_0 = arith.constant 0 : i32
    %4 = arith.cmpi ne, %3, %c0_i32_0 : i32
    scf.if %4 {
      %cst_13 = arith.constant 0xFF800000 : f32
      %29 = vector.broadcast %cst_13 : f32 to vector<128x1xf32>
      %c0_14 = arith.constant 0 : index
      %c0_15 = arith.constant 0 : index
      %30 = vector.load %arg5[%c0_14, %c0_15] : memref<128x1xf32, #tpu.memory_space<vmem>>, vector<128x1xf32>
      tpu.vector_store %arg5[%c0_14, %c0_15], %29 {strides = array<i32>} : memref<128x1xf32, #tpu.memory_space<vmem>>, vector<128x1xf32>,
      %cst_16 = arith.constant 0.000000e+00 : f32
      %31 = vector.broadcast %cst_16 : f32 to vector<128x1xf32>
      %c0_17 = arith.constant 0 : index
      %c0_18 = arith.constant 0 : index
      %32 = vector.load %arg6[%c0_17, %c0_18] : memref<128x1xf32, #tpu.memory_space<vmem>>, vector<128x1xf32>
      tpu.vector_store %arg6[%c0_17, %c0_18], %31 {strides = array<i32>} : memref<128x1xf32, #tpu.memory_space<vmem>>, vector<128x1xf32>,
    } else {
    }
    %c0 = arith.constant 0 : index
    %c0_1 = arith.constant 0 : index
    %5 = vector.load %arg2[%c0, %c0_1] : memref<128x128xf32, #tpu.memory_space<vmem>>, vector<128x128xf32>
    %c0_2 = arith.constant 0 : index
    %c0_3 = arith.constant 0 : index
    %6 = vector.load %arg3[%c0_2, %c0_3] : memref<256x128xf32, #tpu.memory_space<vmem>>, vector<256x128xf32>
    %cst = arith.constant dense<0.000000e+00> : vector<128x256xf32>
    %7 = tpu.matmul %5, %6, %cst {dimension_numbers = #tpu.dot_dimension_numbers<[1], [1], [0], [0], [0, 0, 1, 0], [], []>} : vector<128x128xf32>, vector<256x128xf32>, vector<128x256xf32> -> vector<128x256xf32>
    %c256_i32_4 = arith.constant 256 : i32
    %8 = arith.addi %1, %c256_i32_4 : i32
    %9 = arith.cmpi slt, %0, %8 : i32
    %c128_i32_5 = arith.constant 128 : i32
    %10 = arith.addi %0, %c128_i32_5 : i32
    %11 = arith.cmpi slt, %1, %10 : i32
    %12 = arith.andi %9, %11 : i1
    %c128_i32_6 = arith.constant 128 : i32
    %13 = arith.cmpi slt, %1, %c128_i32_6 : i32
    %c256_i32_7 = arith.constant 256 : i32
    %14 = arith.addi %1, %c256_i32_7 : i32
    %c8_i32 = arith.constant 8 : i32
    %15 = arith.cmpi sgt, %14, %c8_i32 : i32
    %16 = arith.andi %13, %15 : i1
    %c256_i32_8 = arith.constant 256 : i32
    %17 = arith.addi %1, %c256_i32_8 : i32
    %c136_i32 = arith.constant 136 : i32
    %18 = arith.cmpi sgt, %17, %c136_i32 : i32
    %19 = arith.ori %16, %18 : i1
    %20 = arith.ori %12, %19 : i1
    %21 = arith.extui %20 : i1 to i32
    %c0_i32_9 = arith.constant 0 : i32
    %22 = arith.cmpi ne, %21, %c0_i32_9 : i32
    scf.if %22 {
      %29 = tpu.iota {dimensions = array<i32: 0>} : vector<128x1xi32>
      %30 = vector.broadcast %0 : i32 to vector<128x1xi32>
      %31 = arith.addi %29, %30 : vector<128x1xi32>
      %32 = tpu.iota {dimensions = array<i32: 1>} : vector<1x256xi32>
      %33 = vector.broadcast %1 : i32 to vector<1x256xi32>
      %34 = arith.addi %32, %33 : vector<1x256xi32>
      %35 = vector.broadcast %31 : vector<128x1xi32> to vector<128x256xi32>
      %36 = vector.broadcast %34 : vector<1x256xi32> to vector<128x256xi32>
      %37 = arith.cmpi eq, %35, %36 : vector<128x256xi32>
      %c8_i32_13 = arith.constant 8 : i32
      %38 = vector.broadcast %c8_i32_13 : i32 to vector<1x256xi32>
      %39 = arith.cmpi slt, %34, %38 : vector<1x256xi32>
      %c128_i32_14 = arith.constant 128 : i32
      %40 = vector.broadcast %c128_i32_14 : i32 to vector<1x256xi32>
      %41 = arith.cmpi sge, %34, %40 : vector<1x256xi32>
      %c136_i32_15 = arith.constant 136 : i32
      %42 = vector.broadcast %c136_i32_15 : i32 to vector<1x256xi32>
      %43 = arith.cmpi slt, %34, %42 : vector<1x256xi32>
      %44 = arith.andi %41, %43 : vector<1x256xi1>
      %45 = arith.ori %39, %44 : vector<1x256xi1>
      %cst_16 = arith.constant dense<true> : vector<1x256xi1>
      %46 = arith.xori %45, %cst_16 : vector<1x256xi1>
      %47 = vector.broadcast %46 : vector<1x256xi1> to vector<128x256xi1>
      %48 = arith.ori %37, %47 : vector<128x256xi1>
      %cst_17 = arith.constant -3.40282347E+38 : f32
      %49 = vector.broadcast %cst_17 : f32 to vector<128x256xf32>
      %50 = arith.select %48, %49, %7 : vector<128x256xi1>, vector<128x256xf32>
      %c0_18 = arith.constant 0 : index
      %c0_19 = arith.constant 0 : index
      %51 = vector.load %arg5[%c0_18, %c0_19] : memref<128x1xf32, #tpu.memory_space<vmem>>, vector<128x1xf32>
      %cst_20 = arith.constant dense<0xFF800000> : vector<128xf32>
      %52 = vector.multi_reduction <maximumf>, %50, %cst_20 [1] : vector<128x256xf32> to vector<128xf32>
      %53 = vector.shape_cast %52 : vector<128xf32> to vector<128x1xf32>
      %54 = arith.maximumf %51, %53 : vector<128x1xf32>
      %55 = arith.subf %51, %54 : vector<128x1xf32>
      %56 = math.exp %55 : vector<128x1xf32>
      %c0_21 = arith.constant 0 : index
      %c0_22 = arith.constant 0 : index
      %57 = vector.load %arg6[%c0_21, %c0_22] : memref<128x1xf32, #tpu.memory_space<vmem>>, vector<128x1xf32>
      %58 = arith.mulf %56, %57 : vector<128x1xf32>
      %59 = vector.broadcast %54 : vector<128x1xf32> to vector<128x256xf32>
      %60 = arith.subf %50, %59 : vector<128x256xf32>
      %61 = math.exp %60 : vector<128x256xf32>
      %cst_23 = arith.constant dense<0.000000e+00> : vector<128xf32>
      %62 = vector.multi_reduction <add>, %61, %cst_23 [1] : vector<128x256xf32> to vector<128xf32>
      %63 = vector.shape_cast %62 : vector<128xf32> to vector<128x1xf32>
      %64 = arith.addf %58, %63 : vector<128x1xf32>
      %c0_24 = arith.constant 0 : index
      %c0_25 = arith.constant 0 : index
      %65 = vector.load %arg6[%c0_24, %c0_25] : memref<128x1xf32, #tpu.memory_space<vmem>>, vector<128x1xf32>
      tpu.vector_store %arg6[%c0_24, %c0_25], %64 {strides = array<i32>} : memref<128x1xf32, #tpu.memory_space<vmem>>, vector<128x1xf32>,
      %c0_26 = arith.constant 0 : index
      %c0_27 = arith.constant 0 : index
      %66 = vector.load %arg5[%c0_26, %c0_27] : memref<128x1xf32, #tpu.memory_space<vmem>>, vector<128x1xf32>
      tpu.vector_store %arg5[%c0_26, %c0_27], %54 {strides = array<i32>} : memref<128x1xf32, #tpu.memory_space<vmem>>, vector<128x1xf32>,
    } else {
    }
    %true = arith.constant true
    %23 = arith.xori %20, %true : i1
    %24 = arith.extui %23 : i1 to i32
    %c0_i32_10 = arith.constant 0 : i32
    %25 = arith.cmpi ne, %24, %c0_i32_10 : i32
    scf.if %25 {
      %c0_13 = arith.constant 0 : index
      %c0_14 = arith.constant 0 : index
      %29 = vector.load %arg5[%c0_13, %c0_14] : memref<128x1xf32, #tpu.memory_space<vmem>>, vector<128x1xf32>
      %cst_15 = arith.constant dense<0xFF800000> : vector<128xf32>
      %30 = vector.multi_reduction <maximumf>, %7, %cst_15 [1] : vector<128x256xf32> to vector<128xf32>
      %31 = vector.shape_cast %30 : vector<128xf32> to vector<128x1xf32>
      %32 = arith.maximumf %29, %31 : vector<128x1xf32>
      %33 = arith.subf %29, %32 : vector<128x1xf32>
      %34 = math.exp %33 : vector<128x1xf32>
      %c0_16 = arith.constant 0 : index
      %c0_17 = arith.constant 0 : index
      %35 = vector.load %arg6[%c0_16, %c0_17] : memref<128x1xf32, #tpu.memory_space<vmem>>, vector<128x1xf32>
      %36 = arith.mulf %34, %35 : vector<128x1xf32>
      %37 = vector.broadcast %32 : vector<128x1xf32> to vector<128x256xf32>
      %38 = arith.subf %7, %37 : vector<128x256xf32>
      %39 = math.exp %38 : vector<128x256xf32>
      %cst_18 = arith.constant dense<0.000000e+00> : vector<128xf32>
      %40 = vector.multi_reduction <add>, %39, %cst_18 [1] : vector<128x256xf32> to vector<128xf32>
      %41 = vector.shape_cast %40 : vector<128xf32> to vector<128x1xf32>
      %42 = arith.addf %36, %41 : vector<128x1xf32>
      %c0_19 = arith.constant 0 : index
      %c0_20 = arith.constant 0 : index
      %43 = vector.load %arg6[%c0_19, %c0_20] : memref<128x1xf32, #tpu.memory_space<vmem>>, vector<128x1xf32>
      tpu.vector_store %arg6[%c0_19, %c0_20], %42 {strides = array<i32>} : memref<128x1xf32, #tpu.memory_space<vmem>>, vector<128x1xf32>,
      %c0_21 = arith.constant 0 : index
      %c0_22 = arith.constant 0 : index
      %44 = vector.load %arg5[%c0_21, %c0_22] : memref<128x1xf32, #tpu.memory_space<vmem>>, vector<128x1xf32>
      tpu.vector_store %arg5[%c0_21, %c0_22], %32 {strides = array<i32>} : memref<128x1xf32, #tpu.memory_space<vmem>>, vector<128x1xf32>,
    } else {
    }
    %c0_i32_11 = arith.constant 0 : i32
    %26 = arith.cmpi eq, %arg1, %c0_i32_11 : i32
    %27 = arith.extui %26 : i1 to i32
    %c0_i32_12 = arith.constant 0 : i32
    %28 = arith.cmpi ne, %27, %c0_i32_12 : i32
    scf.if %28 {
      %c0_13 = arith.constant 0 : index
      %c0_14 = arith.constant 0 : index
      %29 = vector.load %arg5[%c0_13, %c0_14] : memref<128x1xf32, #tpu.memory_space<vmem>>, vector<128x1xf32>
      %c0_15 = arith.constant 0 : index
      %c0_16 = arith.constant 0 : index
      %30 = vector.load %arg6[%c0_15, %c0_16] : memref<128x1xf32, #tpu.memory_space<vmem>>, vector<128x1xf32>
      %31 = math.log %30 : vector<128x1xf32>
      %32 = arith.addf %29, %31 : vector<128x1xf32>
      %c0_17 = arith.constant 0 : index
      %c0_18 = arith.constant 0 : index
      %33 = vector.load %arg4[%c0_17, %c0_18] : memref<128x1xf32, #tpu.memory_space<vmem>>, vector<128x1xf32>
      tpu.vector_store %arg4[%c0_17, %c0_18], %32 {strides = array<i32>} : memref<128x1xf32, #tpu.memory_space<vmem>>, vector<128x1xf32>,
    } else {
    }
    return
  }
  func.func @transform_0(%arg0: i32, %arg1: i32) -> (i32, i32) {
    %c0_i32 = arith.constant 0 : i32
    %c0_i32_0 = arith.constant 0 : i32
    return %arg0, %c0_i32 : i32, i32
  }
  func.func @transform_1(%arg0: i32, %arg1: i32) -> (i32, i32) {
    %c0_i32 = arith.constant 0 : i32
    %c0_i32_0 = arith.constant 0 : i32
    return %arg1, %c0_i32 : i32, i32
  }
  func.func @transform_2(%arg0: i32, %arg1: i32) -> (i32, i32) {
    %c0_i32 = arith.constant 0 : i32
    %c0_i32_0 = arith.constant 0 : i32
    return %arg0, %c0_i32 : i32, i32
  }
}

</mosaic_0001>

<bundles_post_ra>
// kernel: tpu_custom_call.1
= control target key start
LH: loop header
LB: loop body
LE: loop exit
PB: predicated region body
PF: predicated region fallthrough
CT: control target
= control target key end

     0   :  { %7 = vsyncpa [#allocation5], 0  ;;  %s3120_s0 = inlined_call_operand.hbm [shape: f32[256,128], index: 0, kind: input, shape index: {}]   ;;  %s3121_s1 = inlined_call_operand.hbm [shape: f32[256,128], index: 1, kind: input, shape index: {}]   ;;  %s3122_s2 = inlined_call_operand.vmem [shape: f32[256,1], index: 2, kind: output, shape index: {}]  }
   0x1   :  { %9 = vsyncpa [#allocation5 + $0x1], 0 }
   0x2   :  { %10 = vsyncpa [#allocation7], 0  ;;  %s2144_s9 = smov 0   ;;  %s2146_s10 = smov 0  }
   0x3   :  { %s2148_s11 = smov 0   ;;  %s2150_s12 = smov 0  }
   0x4   :  { %s2152_s13 = smov 0   ;;  %s2154_s14 = smov 0  }
   0x5 LB: > { %s1675_s15 = sadd.s32 4294967295, %s2119_s14   ;;  %p48_p0 = scmp.ne.s32.totalorder %s2103_s10, %s2099_s9  ;;  %s2119_s14 = sphi %s2154_s14, %s16_s14   ;;  %s2115_s13 = sphi %s2152_s13, %s3263_s13   ;;  %s2111_s12 = sphi %s2150_s12, %s3262_s12   ;;  %s2107_s11 = sphi %s2148_s11, %s3261_s11   ;;  %s2103_s10 = sphi %s2146_s10, %s3260_s10   ;;  %s2099_s9 = sphi %s2144_s9, %s3259_s9  }
   0x6   : > { %p2174_p1 = scmp.eq.s32.totalorder %s1675_s15, 0  ;;  %p1677_p2 = scmp.ge.s32.totalorder %s2119_s14, 1 }
   0x7   : > { %p111_p3 = scmp.lt.s32.totalorder %s2119_s14, 3  ;;  %s2121_s19 = smov [#allocation6]  }
   0x8   : > { %s3142_s16 = scalar_select %p2174_p1, 1, 0 }
   0x9   : > { %p2182_p4 = por %p2174_p1, %p48_p0  ;;  %p2186_p5 = pnand %p1677_p2, %p111_p3 }
   0xa   : > { %s126_s20 = sshll.u32 %s2121_s19, 4  ;;  %s28_s22 = sadd.s32 1, %s2115_s13  ;;  %s127_s20 = int_to_ptr.vmem [resolvable:$true] %s126_s20 }
   0xb   : > { %s3143_s17 = scalar_select %p2182_p4, 1, 0 }
   0xc   : > { %s3144_s18 = scalar_select %p2186_p5, 1, 0 }
   0xd   : > { %p1811_p6 = pneg %p2186_p5  ;;  %s2007_s25 = scalar_lea.hbm %s3121_s1, 4096 }
   0xe   : > { %p2008_p8 = scmp.ne.s32.totalorder %s3121_s1, %s2007_s25  ;;  %p2014_p12 = scmp.lt.u32.totalorder %s2007_s25, %s3121_s1 }
   0xf   : > { %p2194_p7 = pnand %p1811_p6, %p2174_p1 }
  0x11   : > { %p2009_p9 = pneg %p2194_p7 }
  0x13   : > { %p2010_p10 = pnand %p2009_p9, %p2008_p8 }
  0x15   : > { %p2011_p11 = pneg %p2010_p10 }
  0x17   : > { %p2016_p13 = pnand %p2014_p12, %p2011_p11 }
  0x19   : > { %2019 = shalt.err (!%p2016_p13)
}
  0x1a   : > { %s2020_s30 = scalar_lea.vmem %s127_s20, 4096  ;;  %p2028_p6 = scmp.lt.s32.totalorder %s127_s20, %s127_s20 }
  0x1b   : > { %p2021_p0 = scmp.ne.s32.totalorder %s127_s20, %s2020_s30  ;;  %p2029_p1 = scmp.lt.s32.totalorder %s2020_s30, %s2020_s30 }
  0x1d   : > { %p2023_p2 = pnand %p2021_p0, %p2009_p9  ;;  %p2030_p4 = por %p2029_p1, %p2028_p6 }
  0x1f   : > { %p2024_p3 = pneg %p2023_p2 }
  0x21   : > { %p2031_p5 = pnand %p2030_p4, %p2024_p3 }
  0x23   : > { %2034 = shalt.err (!%p2031_p5)
}
  0x24   : > { %s2122_s3 = smov 128   ;;  %s2123_s4 = smov 8  }
  0x25   : > { %1814 = dma.hbm_to_vmem [thread:$0]  (!%p2194_p7), %s3121_s1, 4096, %s127_s20, [#allocation7], %s2122_s3, %s2122_s3, %s2123_s4  }
  0x26   : > { %p30_p1 = scmp.ge.s32.totalorder %s28_s22, 2  ;;  %s35_s7 = sadd.s32 1, %s2107_s11 }
  0x27   : > { %p42_p4 = scmp.ne.s32.totalorder %s2107_s11, %s2103_s10  ;;  %p43_p5 = scmp.eq.s32.totalorder %s2119_s14, 0 }
  0x28   : > { %s3265_s22 = smov (%p30_p1, %s28_s22), 0  ;;  %p1820_p9 = scmp.lt.s32.totalorder %s2119_s14, 2 }
  0x29   : > { %p44_p8 = por %p43_p5, %p42_p4  ;;  %s32_s8 = ssub.s32 %s2115_s13, %s3265_s22 }
  0x2a   : > { %s140_s9 = sand.u32 1, %s2107_s11   ;;  %p33_p10 = scmp.eq.s32.totalorder %s32_s8, 0 }
  0x2b   : > { %s1680_s15 = sshll.u32 %s140_s9, 7  ;;  %s1692_s19 = sshll.u32 %s2115_s13, 11 }
  0x2c   : > { %s2230_s21 = scalar_select %p33_p10, %s2107_s11, %s35_s7  }
  0x2d   : > { %s2235_s20 = scalar_lea.hbm %s3120_s0, %s1692_s19  ;;  %s144_s25 = scalar_lea.vmem [#allocation4], %s1680_s15 }
  0x2e   : > { %s151_s26 = sshll.u32 %s144_s25, 4  ;;  %p2237_p7 = pnand %p1820_p9, %p44_p8  ;;  %s2241_s26 = int_to_ptr.vmem [resolvable:$true] %s151_s26 }
  0x2f   : > { %s2243_s28 = scalar_lea.sflag [#allocation5], %s140_s9  ;;  %s2035_s29 = scalar_lea.hbm %s2235_s20, 2048 }
  0x30   : > { %p2036_p11 = scmp.ne.s32.totalorder %s2235_s20, %s2035_s29  ;;  %p2037_p12 = pneg %p2237_p7 }
  0x31   : > { %s2040_s6 = scalar_lea.hbm %s3120_s0, 4096  ;;  %p2041_p2 = scmp.lt.u32.totalorder %s2235_s20, %s3120_s0 }
  0x32   : > { %p2038_p13 = pnand %p2037_p12, %p2036_p11  ;;  %p2042_p3 = scmp.lt.u32.totalorder %s2040_s6, %s2035_s29 }
  0x33   : > { %p2044_p1 = scmp.lt.u32.totalorder %s2035_s29, %s2235_s20 }
  0x34   : > { %p2039_p0 = pneg %p2038_p13  ;;  %p2043_p6 = por %p2042_p3, %p2041_p2 }
  0x36   : > { %p2045_p4 = por %p2044_p1, %p2043_p6 }
  0x38   : > { %p2046_p5 = pnand %p2045_p4, %p2039_p0 }
  0x3a   : > { %2049 = shalt.err (!%p2046_p5)
}
  0x3b   : > { %s2050_s9 = scalar_lea.vmem %s2241_s26, 2048  ;;  %s2124_s15 = smov [#allocation4]  }
  0x3c   : > { %p2051_p8 = scmp.ne.s32.totalorder %s2241_s26, %s2050_s9  ;;  %s2055_s19 = sshll.u32 %s2124_s15, 4  ;;  %s2056_s19 = int_to_ptr.vmem [resolvable:$false] %s2055_s19 }
  0x3d   : > { %s2057_s23 = scalar_lea.vmem %s2056_s19, 4096  ;;  %p2058_p11 = scmp.lt.s32.totalorder %s2241_s26, %s2056_s19 }
  0x3e   : > { %p2053_p9 = pnand %p2051_p8, %p2037_p12  ;;  %p2059_p13 = scmp.lt.s32.totalorder %s2057_s23, %s2050_s9 }
  0x40   : > { %p2054_p10 = pneg %p2053_p9  ;;  %p2060_p2 = por %p2059_p13, %p2058_p11 }
  0x42   : > { %p2061_p3 = pnand %p2060_p2, %p2054_p10 }
  0x44   : > { %2064 = shalt.err (!%p2061_p3)
}
  0x45   : > { %1818 = dma.hbm_to_vmem [thread:$0]  (!%p2237_p7), %s2235_s20, 2048, %s2241_s26, %s2243_s28, %s2122_s3, %s2122_s3, %s2123_s4  }
  0x46   : > { %p3147_p12 = scmp.ne.s32.totalorder %s3144_s18, 0 }
  0x48   : > { %163 = sbr.rel (%p3147_p12) target bundleno = 872 (0x368), region = 28 }
  0x4f   : > { %s165_s24 = sand.u32 1, %s2103_s10   ;;  %p3148_p0 = scmp.ne.s32.totalorder %s3143_s17, 0 }
  0x50   : > { %s1684_s25 = sshll.u32 %s165_s24, 7  ;;  %s166_s29 = scalar_lea.sflag [#allocation5], %s165_s24 }
  0x51   : > { %s2277_s30 = scalar_lea.vmem [#allocation4], %s1684_s25 }
  0x52   : > { %2090 = dma.done.wait (%p3148_p0), %s166_s29, 2048  }
  0x53   : > { %2092 = vsyncadd (%p3148_p0), %s166_s29, 4294965248  ;;  %p3149_p6 = scmp.ne.s32.totalorder %s3142_s16, 0 }
  0x55   : > { %2094 = dma.done.wait (%p3149_p6), [#allocation7], 4096  }
  0x56   : > { %2096 = vsyncadd (%p3149_p6), [#allocation7], 4294963200  ;;  %v273_v0 = vld [vmem:[#allocation6 + $0x80] sm:$0xff]  ;;  %v274_v1 = vld [vmem:[#allocation6 + $0x88] sm:$0xff]  ;;  %vm208_vm0 = vcmask 7168   ;;  %s1688_s16 = sshll.u32 %s2111_s12, 7 }
  0x57   : > { %v257_v2 = vld [vmem:[#allocation6] sm:$0xff]  ;;  %v1757_v3 = vpack.c.bf16 %v274_v1, %v273_v0  ;;  %v258_v4 = vld [vmem:[#allocation6 + $0x8] sm:$0xff]  ;;  %v275_v5 = vld [vmem:[#allocation6 + $0x90] sm:$0xff]  ;;  %v2125_v0 = vmov -inf   ;;  %v466_v1 = vlaneseq  ;;  %vm2126_vm4 = vmmov 1   ;;  %s1686_s17 = sshll.u32 %s2111_s12, 4 }
  0x58   : > { %v276_v6 = vld [vmem:[#allocation6 + $0x98] sm:$0xff]  ;;  %v1759_v7 = vpack.c.bf16 %v258_v4, %v257_v2  ;;  %v259_v9 = vld [vmem:[#allocation6 + $0x10] sm:$0xff]  ;;  %v277_v11 = vld [vmem:[#allocation6 + $0xa0] sm:$0xff]  ;;  %209 = vst.msk [vmem:[#allocation2] sm:$0xff] %vm208_vm0, %v2125_v0  ;;  %v2332_v4 = vstv %s1688_s16  ;;  %p3026_p7 = scmp.lt.s32.totalorder %s1686_s17, 31 }
  0x59   : > { %v1761_v8 = vpack.c.bf16 %v276_v6, %v275_v5  ;;  %1758 = vmatprep.subr.bf16.mxu0 %v1757_v3  ;;  %1789 = vmatprep.subr.bf16.mxu1 %v1757_v3  ;;  %v260_v10 = vld [vmem:[#allocation6 + $0x18] sm:$0xff]  ;;  %v278_v12 = vld [vmem:[#allocation6 + $0xa8] sm:$0xff]  ;;  %v2288_v15 = vld [vmem:[%s2277_s30] sm:$0xff]  ;;  %210 = vst.msk [vmem:[#allocation2 + $0x8] sm:$0xff] %vm208_vm0, %v2125_v0  ;;  %v2328_v2 = vand.u32 127, %v466_v1  ;;  %v2330_v3 = vshrl.u32 %v466_v1, 7 }
  0x5a   : > { %1760 = vmatpush3.bf16.xpose.msra.mxu0 %v1759_v7  ;;  %1797 = vmatpush3.bf16.xpose.msra.mxu1 %v1759_v7  ;;  %v1763_v13 = vpack.c.bf16 %v260_v10, %v259_v9  ;;  %v1765_v14 = vpack.c.bf16 %v278_v12, %v277_v11  ;;  %v2292_v16 = vld [vmem:[%s2277_s30 + $0x40] sm:$0xff]  ;;  %v262_v18 = vld [vmem:[#allocation6 + $0x28] sm:$0xff]  ;;  %v279_v19 = vld [vmem:[#allocation6 + $0xb0] sm:$0xff]  ;;  %211 = vst.msk [vmem:[#allocation2 + $0x10] sm:$0xff] %vm208_vm0, %v2125_v0  ;;  %s3267_s17 = smov (!%p3026_p7, %s1686_s17), 31 }
  0x5b   : > { %1762 = vmatprep.subr.bf16.mxu0 %v1761_v8  ;;  %1790 = vmatprep.subr.bf16.mxu1 %v1761_v8  ;;  %v261_v17 = vld [vmem:[#allocation6 + $0x20] sm:$0xff]  ;;  %v280_v20 = vld [vmem:[#allocation6 + $0xb8] sm:$0xff]  ;;  %v263_v23 = vld [vmem:[#allocation6 + $0x30] sm:$0xff]  ;;  %212 = vst.msk [vmem:[#allocation2 + $0x18] sm:$0xff] %vm208_vm0, %v2125_v0  ;;  %v2335_v5 = vadd.s32 128, %v2328_v2  ;;  %v475_v6 = vadd.s32 64, %v2330_v3  ;;  %v484_v7 = vadd.s32 %v2332_v4, %v2330_v3 }
  0x5c   : > { %1725 = vmatprep.mubr.f32.mxu0 %v2288_v15  ;;  %1741 = vmatprep.mubr.f32.mxu1 %v2292_v16  ;;  %v1767_v21 = vpack.c.bf16 %v262_v18, %v261_v17  ;;  %v1769_v22 = vpack.c.bf16 %v280_v20, %v279_v19  ;;  %v264_v24 = vld [vmem:[#allocation6 + $0x38] sm:$0xff]  ;;  %v281_v25 = vld [vmem:[#allocation6 + $0xc0] sm:$0xff]  ;;  %v282_v26 = vld [vmem:[#allocation6 + $0xc8] sm:$0xff]  ;;  %213 = vst.msk [vmem:[#allocation2 + $0x20] sm:$0xff] %vm208_vm0, %v2125_v0  ;;  %v476_v8 = vadd.s32 72, %v2330_v3  ;;  %vm538_vm1 = vcmp.lt.s32.totalorder %v2328_v2, 8 }
  0x5d   : > { %v1771_v27 = vpack.c.bf16 %v264_v24, %v263_v23  ;;  %v1773_v28 = vpack.c.bf16 %v282_v26, %v281_v25  ;;  %v265_v29 = vld [vmem:[#allocation6 + $0x40] sm:$0xff]  ;;  %v266_v30 = vld [vmem:[#allocation6 + $0x48] sm:$0xff]  ;;  %v283_v31 = vld [vmem:[#allocation6 + $0xd0] sm:$0xff]  ;;  %214 = vst.msk [vmem:[#allocation2 + $0x28] sm:$0xff] %vm208_vm0, %v2125_v0  ;;  %vm543_vm2 = vcmp.lt.s32.totalorder %v2335_v5, 136  ;;  %v492_v9 = vadd.s32 %v2332_v4, %v475_v6  ;;  %s1687_s12 = sshll.u32 %s3267_s17, 3 }
  0x5e   : > { %v284_v32 = vld [vmem:[#allocation6 + $0xd8] sm:$0xff]  ;;  %v1775_v33 = vpack.c.bf16 %v266_v30, %v265_v29  ;;  %v267_v35 = vld [vmem:[#allocation6 + $0x50] sm:$0xff]  ;;  %v285_v37 = vld [vmem:[#allocation6 + $0xe0] sm:$0xff]  ;;  %215 = vst.msk [vmem:[#allocation2 + $0x30] sm:$0xff] %vm208_vm0, %v2125_v0  ;;  %v468_v10 = vadd.s32 8, %v2330_v3  ;;  %vm506_vm3 = vcmp.eq.s32.totalorder %v484_v7, %v2328_v2  ;;  %v493_v12 = vadd.s32 %v2332_v4, %v476_v8  ;;  %s3053_s20 = scalar_lea.vmem %s3122_s2, %s1687_s12 }
  0x5f   : > { %v1777_v34 = vpack.c.bf16 %v284_v32, %v283_v31  ;;  %v268_v36 = vld [vmem:[#allocation6 + $0x58] sm:$0xff]  ;;  %v286_v38 = vld [vmem:[#allocation6 + $0xe8] sm:$0xff]  ;;  %v269_v41 = vld [vmem:[#allocation6 + $0x60] sm:$0xff]  ;;  %216 = vst.msk [vmem:[#allocation2 + $0x38] sm:$0xff] %vm208_vm0, %v2125_v0  ;;  %vm507_vm6 = vcmp.eq.s32.totalorder %v484_v7, %v2335_v5  ;;  %vm522_vm8 = vcmp.eq.s32.totalorder %v492_v9, %v2328_v2  ;;  %vm523_vm10 = vcmp.eq.s32.totalorder %v492_v9, %v2335_v5 }
  0x60   : > { %v1779_v39 = vpack.c.bf16 %v268_v36, %v267_v35  ;;  %v1781_v40 = vpack.c.bf16 %v286_v38, %v285_v37  ;;  %v270_v42 = vld [vmem:[#allocation6 + $0x68] sm:$0xff]  ;;  %v287_v43 = vld [vmem:[#allocation6 + $0xf0] sm:$0xff]  ;;  %v288_v44 = vld [vmem:[#allocation6 + $0xf8] sm:$0xff]  ;;  %217 = vst.msk [vmem:[#allocation2 + $0x40] sm:$0xff] %vm208_vm0, %v2125_v0  ;;  %vm524_vm12 = vcmp.eq.s32.totalorder %v493_v12, %v2328_v2  ;;  %v470_v20 = vadd.s32 24, %v2330_v3 }
  0x61   : > { %v1783_v45 = vpack.c.bf16 %v270_v42, %v269_v41  ;;  %v1785_v46 = vpack.c.bf16 %v288_v44, %v287_v43  ;;  %v271_v47 = vld [vmem:[#allocation6 + $0x70] sm:$0xff]  ;;  %v272_v48 = vld [vmem:[#allocation6 + $0x78] sm:$0xff]  ;;  %v242_v50 = vld [vmem:[%s2277_s30 + $0x8] sm:$0xff]  ;;  %218 = vst.msk [vmem:[#allocation2 + $0x48] sm:$0xff] %vm208_vm0, %v2125_v0  ;;  %vm525_vm14 = vcmp.eq.s32.totalorder %v493_v12, %v2335_v5  ;;  %v478_v24 = vadd.s32 88, %v2330_v3 }
  0x62   : > { %1764 = vmatpush3.bf16.xpose.msra.mxu0 %v1763_v13  ;;  %1798 = vmatpush3.bf16.xpose.msra.mxu1 %v1763_v13  ;;  %v1787_v49 = vpack.c.bf16 %v272_v48, %v271_v47  ;;  %v250_v51 = vld [vmem:[%s2277_s30 + $0x48] sm:$0xff]  ;;  %v243_v52 = vld [vmem:[%s2277_s30 + $0x10] sm:$0xff]  ;;  %v244_v54 = vld [vmem:[%s2277_s30 + $0x18] sm:$0xff]  ;;  %219 = vst.msk [vmem:[#allocation2 + $0x50] sm:$0xff] %vm208_vm0, %v2125_v0  ;;  %v469_v13 = vadd.s32 16, %v2330_v3  ;;  %v487_v32 = vadd.s32 %v2332_v4, %v470_v20  ;;  %v479_v41 = vadd.s32 96, %v2330_v3 }
  0x63   : > { %1766 = vmatprep.subr.bf16.mxu0 %v1765_v14  ;;  %1791 = vmatprep.subr.bf16.mxu1 %v1765_v14  ;;  %v251_v53 = vld [vmem:[%s2277_s30 + $0x50] sm:$0xff]  ;;  %v252_v55 = vld [vmem:[%s2277_s30 + $0x58] sm:$0xff]  ;;  %v245_v56 = vld [vmem:[%s2277_s30 + $0x20] sm:$0xff]  ;;  %220 = vst.msk [vmem:[#allocation2 + $0x58] sm:$0xff] %vm208_vm0, %v2125_v0  ;;  %v473_v9 = vadd.s32 48, %v2330_v3 }
  0x64   : > { %v253_v57 = vld [vmem:[%s2277_s30 + $0x60] sm:$0xff]  ;;  %v246_v58 = vld [vmem:[%s2277_s30 + $0x28] sm:$0xff]  ;;  %v247_v60 = vld [vmem:[%s2277_s30 + $0x30] sm:$0xff]  ;;  %221 = vst.msk [vmem:[#allocation2 + $0x60] sm:$0xff] %vm208_vm0, %v2125_v0  ;;  %v486_v19 = vadd.s32 %v2332_v4, %v469_v13 }
  0x65   : > { %v254_v59 = vld [vmem:[%s2277_s30 + $0x68] sm:$0xff]  ;;  %v255_v61 = vld [vmem:[%s2277_s30 + $0x70] sm:$0xff]  ;;  %v248_v62 = vld [vmem:[%s2277_s30 + $0x38] sm:$0xff]  ;;  %222 = vst.msk [vmem:[#allocation2 + $0x68] sm:$0xff] %vm208_vm0, %v2125_v0 }
  0x66   : > { %v256_v63 = vld [vmem:[%s2277_s30 + $0x78] sm:$0xff]  ;;  %223 = vst.msk [vmem:[#allocation2 + $0x70] sm:$0xff] %vm208_vm0, %v2125_v0  ;;  %224 = vst.msk [vmem:[#allocation2 + $0x78] sm:$0xff] %vm208_vm0, %v2125_v0 }
  0x67   : > { %vm2346_vm5 = vmxor %vm538_vm1, %vm2126_vm4 }
  0x68   : > { %vm2353_vm7 = vmxor %vm543_vm2, %vm2126_vm4 }
  0x69   : > { %vm2362_vm9 = vmor %vm506_vm3, %vm2346_vm5 }
  0x6a   : > { %1768 = vmatpush3.bf16.xpose.msra.mxu0 %v1767_v21  ;;  %1799 = vmatpush3.bf16.xpose.msra.mxu1 %v1767_v21  ;;  %vm2369_vm11 = vmor %vm507_vm6, %vm2353_vm7  ;;  %vm510_vm6 = vcmp.eq.s32.totalorder %v486_v19, %v2328_v2 }
  0x6b   : > { %1770 = vmatprep.subr.bf16.mxu0 %v1769_v22  ;;  %1792 = vmatprep.subr.bf16.mxu1 %v1769_v22  ;;  %vm2378_vm13 = vmor %vm522_vm8, %vm2346_vm5 }
  0x6c   : > { %vm2385_vm15 = vmor %vm523_vm10, %vm2353_vm7 }
  0x6d   : > { %vm2394_vm2 = vmor %vm524_vm12, %vm2346_vm5 }
  0x6e   : > { %vm2405_vm4 = vmor %vm525_vm14, %vm2353_vm7 }
  0x6f   : > { %vm2448_vm12 = vmor %vm510_vm6, %vm2346_vm5 }
  0x72   : > { %1772 = vmatpush3.bf16.xpose.msra.mxu0 %v1771_v27  ;;  %1800 = vmatpush3.bf16.xpose.msra.mxu1 %v1771_v27 }
  0x73   : > { %1774 = vmatprep.subr.bf16.mxu0 %v1773_v28  ;;  %1793 = vmatprep.subr.bf16.mxu1 %v1773_v28 }
  0x7a   : > { %1776 = vmatpush3.bf16.xpose.msra.mxu0 %v1775_v33  ;;  %1801 = vmatpush3.bf16.xpose.msra.mxu1 %v1775_v33  ;;  %v471_v33 = vadd.s32 32, %v2330_v3 }
  0x7b   : > { %1778 = vmatprep.subr.bf16.mxu0 %v1777_v34  ;;  %1794 = vmatprep.subr.bf16.mxu1 %v1777_v34 }
  0x82   : > { %1780 = vmatpush3.bf16.xpose.msra.mxu0 %v1779_v39  ;;  %1802 = vmatpush3.bf16.xpose.msra.mxu1 %v1779_v39 }
  0x83   : > { %1782 = vmatprep.subr.bf16.mxu0 %v1781_v40  ;;  %1795 = vmatprep.subr.bf16.mxu1 %v1781_v40  ;;  %v495_v40 = vadd.s32 %v2332_v4, %v478_v24 }
  0x8a   : > { %1784 = vmatpush3.bf16.xpose.msra.mxu0 %v1783_v45  ;;  %1803 = vmatpush3.bf16.xpose.msra.mxu1 %v1783_v45  ;;  %v472_v45 = vadd.s32 40, %v2330_v3 }
  0x8b   : > { %1786 = vmatprep.subr.bf16.mxu0 %v1785_v46  ;;  %1796 = vmatprep.subr.bf16.mxu1 %v1785_v46 }
  0x92   : > { %1788 = vmatpush3.bf16.xpose.msra.mxu0 %v1787_v49  ;;  %1804 = vmatpush3.bf16.xpose.msra.mxu1 %v1787_v49 }
  0x99   : > { %1726 = vmatmul.mubr.f32.vlgmr.msra.gmra.mrb[0].mxu0 %v2288_v15  ;;  %1742 = vmatmul.mubr.f32.vlgmr.msra.gmra.mrb[0].mxu1 %v2292_v16  ;;  %v485_v15 = vadd.s32 %v2332_v4, %v468_v10  ;;  %v477_v16 = vadd.s32 80, %v2330_v3 }
  0x9a   : > { %1727 = vmatprep.mubr.f32.mxu0 %v242_v50  ;;  %1743 = vmatprep.mubr.f32.mxu1 %v250_v51 }
  0x9b   : > { %vm508_vm1 = vcmp.eq.s32.totalorder %v485_v15, %v2328_v2  ;;  %v494_v23 = vadd.s32 %v2332_v4, %v477_v16  ;;  %vm509_vm3 = vcmp.eq.s32.totalorder %v485_v15, %v2335_v5 }
  0x9c   : > { %vm2428_vm8 = vmor %vm508_vm1, %vm2346_vm5  ;;  %vm513_vm1 = vcmp.eq.s32.totalorder %v487_v32, %v2335_v5 }
  0x9d   : > { %1728 = vmatmul.mubr.f32.gmra.mrb[2].mxu0 %v242_v50  ;;  %1744 = vmatmul.mubr.f32.gmra.mrb[2].mxu1 %v250_v51  ;;  %vm2437_vm10 = vmor %vm509_vm3, %vm2353_vm7  ;;  %v488_v51 = vadd.s32 %v2332_v4, %v471_v33 }
  0x9e   : > { %1729 = vmatprep.mubr.f32.mxu0 %v243_v52  ;;  %1745 = vmatprep.mubr.f32.mxu1 %v251_v53 }
  0xa1   : > { %1730 = vmatmul.mubr.f32.gmra.mrb[4].mxu0 %v243_v52  ;;  %1746 = vmatmul.mubr.f32.gmra.mrb[4].mxu1 %v251_v53 }
  0xa2   : > { %1731 = vmatprep.mubr.f32.mxu0 %v244_v54  ;;  %1747 = vmatprep.mubr.f32.mxu1 %v252_v55 }
  0xa5   : > { %1732 = vmatmul.mubr.f32.gmra.mrb[6].mxu0 %v244_v54  ;;  %1748 = vmatmul.mubr.f32.gmra.mrb[6].mxu1 %v252_v55 }
  0xa6   : > { %1733 = vmatprep.mubr.f32.mxu0 %v245_v56  ;;  %1749 = vmatprep.mubr.f32.mxu1 %v253_v57 }
  0xa9   : > { %1734 = vmatmul.mubr.f32.gmra.mrb[8].mxu0 %v245_v56  ;;  %1750 = vmatmul.mubr.f32.gmra.mrb[8].mxu1 %v253_v57 }
  0xaa   : > { %1735 = vmatprep.mubr.f32.mxu0 %v246_v58  ;;  %1751 = vmatprep.mubr.f32.mxu1 %v254_v59 }
  0xad   : > { %1736 = vmatmul.mubr.f32.gmra.mrb[10].mxu0 %v246_v58  ;;  %1752 = vmatmul.mubr.f32.gmra.mrb[10].mxu1 %v254_v59  ;;  %v496_v58 = vadd.s32 %v2332_v4, %v479_v41  ;;  %v480_v59 = vadd.s32 104, %v2330_v3  ;;  %v482_v41 = vadd.s32 120, %v2330_v3 }
  0xae   : > { %1737 = vmatprep.mubr.f32.mxu0 %v247_v60  ;;  %1753 = vmatprep.mubr.f32.mxu1 %v255_v61 }
  0xaf   : > { %v497_v18 = vadd.s32 %v2332_v4, %v480_v59 }
  0xb1   : > { %1738 = vmatmul.mubr.f32.gmra.mrb[12].mxu0 %v247_v60  ;;  %1754 = vmatmul.mubr.f32.gmra.mrb[12].mxu1 %v255_v61 }
  0xb2   : > { %1739 = vmatprep.mubr.f32.mxu0 %v248_v62  ;;  %1755 = vmatprep.mubr.f32.mxu1 %v256_v63 }
  0xb5   : > { %1740 = vmatmul.mubr.f32.gmra.mrb[14].mxu0 %v248_v62  ;;  %1756 = vmatmul.mubr.f32.gmra.mrb[14].mxu1 %v256_v63  ;;  %v489_v63 = vadd.s32 %v2332_v4, %v472_v45 }
 0x16c   : > { %v355_v25 = vpop.f32.mrb[0].mxu0  ;;  %v403_v26 = vpop.f32.mrb[0].mxu1 }
 0x16d   : > { %v2401_v28 = vsel %vm2362_vm9, -3.4028235e+38, %v355_v25  ;;  %v357_v29 = vpop.f32.mrb[1].mxu0  ;;  %v405_v30 = vpop.f32.mrb[1].mxu1  ;;  %v2418_v35 = vsel %vm2378_vm13, -3.4028235e+38, %v403_v26  ;;  %vm511_vm9 = vcmp.eq.s32.totalorder %v486_v19, %v2335_v5  ;;  %vm527_vm13 = vcmp.eq.s32.totalorder %v494_v23, %v2335_v5 }
 0x16e   : > { %v2414_v34 = vsel %vm2369_vm11, -3.4028235e+38, %v357_v29  ;;  %v2422_v36 = vsel %vm2385_vm15, -3.4028235e+38, %v405_v30  ;;  %vm526_vm11 = vcmp.eq.s32.totalorder %v494_v23, %v2328_v2  ;;  %vm2464_vm14 = vmor %vm511_vm9, %vm2353_vm7  ;;  %vm512_vm15 = vcmp.eq.s32.totalorder %v487_v32, %v2328_v2 }
 0x16f   : > { %v634_v38 = vmax.f32 %v2401_v28, %v2414_v34  ;;  %v658_v49 = vmax.f32 %v2418_v35, %v2422_v36  ;;  %vm2497_vm3 = vmor %vm527_vm13, %vm2353_vm7  ;;  %v481_v19 = vadd.s32 112, %v2330_v3  ;;  %v490_v29 = vadd.s32 %v2332_v4, %v473_v9 }
 0x170   : > { %v409_v42 = vpop.f32.mrb[2].mxu1  ;;  %v361_v43 = vpop.f32.mrb[2].mxu0  ;;  %vm2506_vm6 = vmor %vm512_vm15, %vm2346_vm5  ;;  %v474_v30 = vadd.s32 56, %v2330_v3 }
 0x171   : > { %v2456_v46 = vsel %vm2394_vm2, -3.4028235e+38, %v409_v42  ;;  %v411_v47 = vpop.f32.mrb[3].mxu1  ;;  %635 = vmax.xlane.f32.xlu0 %v634_v38  ;;  %v363_v48 = vpop.f32.mrb[3].mxu0  ;;  %v2476_v53 = vsel %vm2428_vm8, -3.4028235e+38, %v361_v43  ;;  %vm2487_vm2 = vmor %vm526_vm11, %vm2346_vm5  ;;  %vm529_vm8 = vcmp.eq.s32.totalorder %v495_v40, %v2335_v5 }
 0x172   : > { %v2472_v52 = vsel %vm2405_vm4, -3.4028235e+38, %v411_v47  ;;  %v2480_v54 = vsel %vm2437_vm10, -3.4028235e+38, %v363_v48  ;;  %vm528_vm4 = vcmp.eq.s32.totalorder %v495_v40, %v2328_v2  ;;  %vm2522_vm9 = vmor %vm513_vm1, %vm2353_vm7  ;;  %vm514_vm10 = vcmp.eq.s32.totalorder %v488_v51, %v2328_v2 }
 0x173   : > { %v661_v56 = vmax.f32 %v2456_v46, %v2472_v52  ;;  %v637_v6 = vmax.f32 %v2476_v53, %v2480_v54  ;;  %vm2544_vm11 = vmor %vm528_vm4, %vm2346_vm5  ;;  %vm516_vm1 = vcmp.eq.s32.totalorder %v489_v63, %v2328_v2  ;;  %vm517_vm4 = vcmp.eq.s32.totalorder %v489_v63, %v2335_v5 }
 0x174   : > { %v367_v60 = vpop.f32.mrb[4].mxu0  ;;  %v415_v62 = vpop.f32.mrb[4].mxu1  ;;  %vm2555_vm13 = vmor %vm529_vm8, %vm2353_vm7  ;;  %v498_v40 = vadd.s32 %v2332_v4, %v481_v19  ;;  %v491_v50 = vadd.s32 %v2332_v4, %v474_v30 }
 0x175   : > { %v2514_v0 = vsel %vm2448_vm12, -3.4028235e+38, %v367_v60  ;;  %662 = vmax.xlane.f32.xlu1 %v661_v56  ;;  %659 = vmax.xlane.f32.xlu0 %v658_v49  ;;  %v369_v1 = vpop.f32.mrb[5].mxu0  ;;  %v417_v8 = vpop.f32.mrb[5].mxu1  ;;  %v2534_v12 = vsel %vm2487_vm2, -3.4028235e+38, %v415_v62  ;;  %vm515_vm12 = vcmp.eq.s32.totalorder %v488_v51, %v2335_v5  ;;  %vm2564_vm15 = vmor %vm514_vm10, %vm2346_vm5  ;;  %vm531_vm2 = vcmp.eq.s32.totalorder %v496_v58, %v2335_v5 }
 0x176   : > { %v2530_v10 = vsel %vm2464_vm14, -3.4028235e+38, %v369_v1  ;;  %v2538_v13 = vsel %vm2497_vm3, -3.4028235e+38, %v417_v8  ;;  %vm530_vm14 = vcmp.eq.s32.totalorder %v496_v58, %v2328_v2  ;;  %vm2578_vm3 = vmor %vm515_vm12, %vm2353_vm7  ;;  %v499_v60 = vadd.s32 %v2332_v4, %v482_v41  ;;  %v2804_v58 = vld [vmem:[#allocation2 + $0x48] sm:$0xff] }
 0x177   : > { %v640_v16 = vmax.f32 %v2514_v0, %v2530_v10  ;;  %v664_v27 = vmax.f32 %v2534_v12, %v2538_v13  ;;  %vm2613_vm8 = vmor %vm531_vm2, %vm2353_vm7  ;;  %vm534_vm2 = vcmp.eq.s32.totalorder %v498_v40, %v2328_v2  ;;  %v2127_v1 = vmov 0  }
 0x178   : > { %v373_v20 = vpop.f32.mrb[6].mxu0  ;;  %v421_v21 = vpop.f32.mrb[6].mxu1  ;;  %vm2624_vm10 = vmor %vm516_vm1, %vm2346_vm5  ;;  %1877 = vset.pattern.permute.xlu0 %v2127_v1  ;;  %1878 = vset.pattern.permute.xlu1 %v2127_v1 }
 0x179   : > { %v2572_v23 = vsel %vm2506_vm6, -3.4028235e+38, %v373_v20  ;;  %638 = vmax.xlane.f32.xlu0 %v637_v6  ;;  %641 = vmax.xlane.f32.xlu1 %v640_v16  ;;  %v375_v24 = vpop.f32.mrb[7].mxu0  ;;  %v423_v25 = vpop.f32.mrb[7].mxu1  ;;  %v2592_v32 = vsel %vm2544_vm11, -3.4028235e+38, %v421_v21  ;;  %vm2603_vm6 = vmor %vm530_vm14, %vm2346_vm5  ;;  %vm533_vm11 = vcmp.eq.s32.totalorder %v497_v18, %v2335_v5 }
 0x17a   : > { %v2588_v31 = vsel %vm2522_vm9, -3.4028235e+38, %v375_v24  ;;  %v2596_v33 = vsel %vm2555_vm13, -3.4028235e+38, %v423_v25  ;;  %vm532_vm9 = vcmp.eq.s32.totalorder %v497_v18, %v2328_v2  ;;  %vm2639_vm12 = vmor %vm517_vm4, %vm2353_vm7  ;;  %vm518_vm13 = vcmp.eq.s32.totalorder %v490_v29, %v2328_v2 }
 0x17b   : > { %v643_v38 = vmax.f32 %v2572_v23, %v2588_v31  ;;  %v667_v3 = vmax.f32 %v2592_v32, %v2596_v33  ;;  %vm2661_vm14 = vmor %vm532_vm9, %vm2346_vm5  ;;  %vm535_vm4 = vcmp.eq.s32.totalorder %v498_v40, %v2335_v5  ;;  %vm521_vm9 = vcmp.eq.s32.totalorder %v491_v50, %v2335_v5 }
 0x17c   : > { %v379_v42 = vpop.f32.mrb[8].mxu0  ;;  %v427_v44 = vpop.f32.mrb[8].mxu1  ;;  %vm2670_vm1 = vmor %vm533_vm11, %vm2353_vm7 }
 0x17d   : > { %644 = vmax.xlane.f32.xlu1 %v643_v38  ;;  %v2631_v45 = vsel %vm2564_vm15, -3.4028235e+38, %v379_v42  ;;  %v381_v47 = vpop.f32.mrb[9].mxu0  ;;  %665 = vmax.xlane.f32.xlu0 %v664_v27  ;;  %v429_v49 = vpop.f32.mrb[9].mxu1  ;;  %v2651_v55 = vsel %vm2603_vm6, -3.4028235e+38, %v427_v44  ;;  %vm519_vm15 = vcmp.eq.s32.totalorder %v490_v29, %v2335_v5  ;;  %vm583_vm11 = vmor %vm535_vm4, %vm2353_vm7 }
 0x17e   : > { %v2647_v51 = vsel %vm2578_vm3, -3.4028235e+38, %v381_v47  ;;  %v2655_v56 = vsel %vm2613_vm8, -3.4028235e+38, %v429_v49  ;;  %vm2680_vm3 = vmor %vm518_vm13, %vm2346_vm5  ;;  %vm520_vm8 = vcmp.eq.s32.totalorder %v491_v50, %v2328_v2  ;;  %v2799_v49 = vld [vmem:[#allocation2] sm:$0xff]  ;;  %v2916_v27 = vld [vmem:[#allocation2 + $0x38] sm:$0xff] }
 0x17f   : > { %v646_v59 = vmax.f32 %v2631_v45, %v2647_v51  ;;  %vm2693_vm6 = vmor %vm519_vm15, %vm2353_vm7  ;;  %v670_v9 = vmax.f32 %v2651_v55, %v2655_v56  ;;  %3221 = vst [vmem:[#allocation19_spill] sm:$0xff] %v2916_v27 }
 0x180   : > { %v385_v61 = vpop.f32.mrb[10].mxu0  ;;  %v433_v62 = vpop.f32.mrb[10].mxu1  ;;  %vm2730_vm13 = vmor %vm520_vm8, %vm2346_vm5 }
 0x181   : > { %v2687_v6 = vsel %vm2624_vm10, -3.4028235e+38, %v385_v61  ;;  %668 = vmax.xlane.f32.xlu1 %v667_v3  ;;  %v387_v7 = vpop.f32.mrb[11].mxu0  ;;  %v435_v4 = vpop.f32.mrb[11].mxu1  ;;  %647 = vmax.xlane.f32.xlu0 %v646_v59  ;;  %v2706_v16 = vsel %vm2661_vm14, -3.4028235e+38, %v433_v62  ;;  %vm2717_vm10 = vmor %vm534_vm2, %vm2346_vm5  ;;  %vm537_vm14 = vcmp.eq.s32.totalorder %v499_v60, %v2335_v5 }
 0x182   : > { %v2702_v15 = vsel %vm2639_vm12, -3.4028235e+38, %v387_v7  ;;  %v2710_v17 = vsel %vm2670_vm1, -3.4028235e+38, %v435_v4  ;;  %vm536_vm12 = vcmp.eq.s32.totalorder %v499_v60, %v2328_v2  ;;  %vm2743_vm15 = vmor %vm521_vm9, %vm2353_vm7  ;;  %v2128_v3 = vmov 0.0   ;;  %v2806_v59 = vld [vmem:[#allocation2 + $0x40] sm:$0xff] }
 0x183   : > { %v649_v19 = vmax.f32 %v2687_v6, %v2702_v15  ;;  %v673_v26 = vmax.f32 %v2706_v16, %v2710_v17  ;;  %vm584_vm1 = vmor %vm536_vm12, %vm2346_vm5  ;;  %225 = vst.msk [vmem:[#allocation3] sm:$0xff] %vm208_vm0, %v2128_v3  ;;  %v2819_v7 = vld [vmem:[#allocation2 + $0x8] sm:$0xff]  ;;  %v2821_v4 = vld [vmem:[#allocation2 + $0x10] sm:$0xff] }
 0x184   : > { %v391_v20 = vpop.f32.mrb[12].mxu0  ;;  %v439_v22 = vpop.f32.mrb[12].mxu1  ;;  %vm585_vm2 = vmor %vm537_vm14, %vm2353_vm7  ;;  %226 = vst.msk [vmem:[#allocation3 + $0x8] sm:$0xff] %vm208_vm0, %v2128_v3 }
 0x185   : > { %650 = vmax.xlane.f32.xlu1 %v649_v19  ;;  %v2737_v24 = vsel %vm2680_vm3, -3.4028235e+38, %v391_v20  ;;  %v393_v25 = vpop.f32.mrb[13].mxu0  ;;  %v441_v29 = vpop.f32.mrb[13].mxu1  ;;  %671 = vmax.xlane.f32.xlu0 %v670_v9  ;;  %v2753_v30 = vsel %vm2717_vm10, -3.4028235e+38, %v439_v22 }
 0x186   : > { %v2749_v5 = vsel %vm2693_vm6, -3.4028235e+38, %v393_v25  ;;  %v2755_v37 = vsel %vm583_vm11, -3.4028235e+38, %v441_v29  ;;  %227 = vst.msk [vmem:[#allocation3 + $0x10] sm:$0xff] %vm208_vm0, %v2128_v3  ;;  %228 = vst.msk [vmem:[#allocation3 + $0x18] sm:$0xff] %vm208_vm0, %v2128_v3 }
 0x187   : > { %v652_v38 = vmax.f32 %v2737_v24, %v2749_v5  ;;  %v676_v2 = vmax.f32 %v2753_v30, %v2755_v37  ;;  %229 = vst.msk [vmem:[#allocation3 + $0x20] sm:$0xff] %vm208_vm0, %v2128_v3  ;;  %230 = vst.msk [vmem:[#allocation3 + $0x28] sm:$0xff] %vm208_vm0, %v2128_v3  ;;  %v2839_v22 = vld [vmem:[#allocation2 + $0x18] sm:$0xff]  ;;  %v2841_v25 = vld [vmem:[#allocation2 + $0x50] sm:$0xff] }
 0x188   : > { %v397_v39 = vpop.f32.mrb[14].mxu0  ;;  %v445_v40 = vpop.f32.mrb[14].mxu1  ;;  %231 = vst.msk [vmem:[#allocation3 + $0x30] sm:$0xff] %vm208_vm0, %v2128_v3  ;;  %232 = vst.msk [vmem:[#allocation3 + $0x38] sm:$0xff] %vm208_vm0, %v2128_v3  ;;  %v2918_v9 = vld [vmem:[#allocation2 + $0x70] sm:$0xff] }
 0x189   : > { %v2767_v41 = vsel %vm2730_vm13, -3.4028235e+38, %v397_v39  ;;  %674 = vmax.xlane.f32.xlu1 %v673_v26  ;;  %v399_v42 = vpop.f32.mrb[15].mxu0  ;;  %v2769_v43 = vsel %vm584_vm1, -3.4028235e+38, %v445_v40  ;;  %v447_v11 = vpop.f32.mrb[15].mxu1  ;;  %653 = vmax.xlane.f32.xlu0 %v652_v38 }
 0x18a   : > { %v2775_v14 = vsel %vm2743_vm15, -3.4028235e+38, %v399_v42  ;;  %v2777_v44 = vsel %vm585_vm2, -3.4028235e+38, %v447_v11  ;;  %233 = vst.msk [vmem:[#allocation3 + $0x40] sm:$0xff] %vm208_vm0, %v2128_v3  ;;  %234 = vst.msk [vmem:[#allocation3 + $0x48] sm:$0xff] %vm208_vm0, %v2128_v3 }
 0x18b   : > { %v655_v47 = vmax.f32 %v2767_v41, %v2775_v14  ;;  %235 = vst.msk [vmem:[#allocation3 + $0x50] sm:$0xff] %vm208_vm0, %v2128_v3  ;;  %236 = vst.msk [vmem:[#allocation3 + $0x58] sm:$0xff] %vm208_vm0, %v2128_v3  ;;  %v679_v48 = vmax.f32 %v2769_v43, %v2777_v44  ;;  %v2858_v42 = vld [vmem:[#allocation2 + $0x58] sm:$0xff]  ;;  %v2860_v11 = vld [vmem:[#allocation2 + $0x20] sm:$0xff] }
 0x18c   : > { %237 = vst.msk [vmem:[#allocation3 + $0x60] sm:$0xff] %vm208_vm0, %v2128_v3  ;;  %238 = vst.msk [vmem:[#allocation3 + $0x68] sm:$0xff] %vm208_vm0, %v2128_v3 }
 0x18d   : > { %239 = vst.msk [vmem:[#allocation3 + $0x70] sm:$0xff] %vm208_vm0, %v2128_v3  ;;  %240 = vst.msk [vmem:[#allocation3 + $0x78] sm:$0xff] %vm208_vm0, %v2128_v3  ;;  %656 = vmax.xlane.f32.xlu1 %v655_v47  ;;  %677 = vmax.xlane.f32.xlu0 %v676_v2  ;;  %v2897_v2 = vld [vmem:[#allocation2 + $0x68] sm:$0xff]  ;;  %v2899_v47 = vld [vmem:[#allocation2 + $0x30] sm:$0xff] }
 0x18e   : > { %3217 = vst [vmem:[#allocation15_spill] sm:$0xff] %v2897_v2  ;;  %3218 = vst [vmem:[#allocation16_spill] sm:$0xff] %v2899_v47 }
 0x18f   : > { %3222 = vst [vmem:[#allocation20_spill] sm:$0xff] %v2918_v9 }
 0x191   : > { %680 = vmax.xlane.f32.xlu1 %v679_v48 }
 0x1fe   : > { %v636_v50 = vpop.xlane.xlu0 %635 }
 0x1ff   : > { %v2802_v57 = vmax.f32 %v2799_v49, %v636_v50 }
 0x201   : > { %1035 = vst.msk [vmem:[#allocation2] sm:$0xff] %vm208_vm0, %v2802_v57  ;;  %780 = vperm.xlu0 %1877, %v2802_v57  }
 0x202   : > { %v663_v61 = vpop.xlane.xlu1 %662  ;;  %v660_v62 = vpop.xlane.xlu0 %659 }
 0x203   : > { %v2814_v63 = vmax.f32 %v2804_v58, %v663_v61  ;;  %v2817_v1 = vmax.f32 %v2806_v59, %v660_v62  ;;  %v2877_v62 = vld [vmem:[#allocation2 + $0x28] sm:$0xff] }
 0x204   : > { %3213 = vst [vmem:[#allocation11_spill] sm:$0xff] %v2877_v62 }
 0x205   : > { %1044 = vst.msk [vmem:[#allocation2 + $0x48] sm:$0xff] %vm208_vm0, %v2814_v63  ;;  %1043 = vst.msk [vmem:[#allocation2 + $0x40] sm:$0xff] %vm208_vm0, %v2817_v1  ;;  %820 = vperm.xlu1 %1878, %v2817_v1   ;;  %825 = vperm.xlu0 %1877, %v2814_v63  }
 0x206   : > { %v639_v18 = vpop.xlane.xlu0 %638  ;;  %v642_v19 = vpop.xlane.xlu1 %641 }
 0x207   : > { %v2834_v20 = vmax.f32 %v2819_v7, %v639_v18  ;;  %v2837_v21 = vmax.f32 %v2821_v4, %v642_v19  ;;  %v2879_v18 = vld [vmem:[#allocation2 + $0x60] sm:$0xff] }
 0x208   : > { %3214 = vst [vmem:[#allocation12_spill] sm:$0xff] %v2879_v18 }
 0x209   : > { %1036 = vst.msk [vmem:[#allocation2 + $0x8] sm:$0xff] %vm208_vm0, %v2834_v20  ;;  %1037 = vst.msk [vmem:[#allocation2 + $0x10] sm:$0xff] %vm208_vm0, %v2837_v21  ;;  %785 = vperm.xlu1 %1878, %v2834_v20  }
 0x20a   : > { %v645_v29 = vpop.xlane.xlu1 %644  ;;  %v666_v38 = vpop.xlane.xlu0 %665 }
 0x20b   : > { %v2853_v39 = vmax.f32 %v2839_v22, %v645_v29  ;;  %v2856_v40 = vmax.f32 %v2841_v25, %v666_v38 }
 0x20d   : > { %1038 = vst.msk [vmem:[#allocation2 + $0x18] sm:$0xff] %vm208_vm0, %v2853_v39  ;;  %1045 = vst.msk [vmem:[#allocation2 + $0x50] sm:$0xff] %vm208_vm0, %v2856_v40  ;;  %790 = vperm.xlu1 %1878, %v2837_v21  }
 0x20e   : > { %v669_v3 = vpop.xlane.xlu1 %668  ;;  %v648_v48 = vpop.xlane.xlu0 %647 }
 0x20f   : > { %v2872_v50 = vmax.f32 %v2858_v42, %v669_v3  ;;  %v2875_v61 = vmax.f32 %v2860_v11, %v648_v48 }
 0x211   : > { %3212 = vst [vmem:[#allocation10_spill] sm:$0xff] %v2875_v61  ;;  %1046 = vst.msk [vmem:[#allocation2 + $0x58] sm:$0xff] %vm208_vm0, %v2872_v50  ;;  %830 = vperm.xlu1 %1878, %v2856_v40   ;;  %835 = vperm.xlu0 %1877, %v2872_v50  }
 0x212   : > { %1039 = vst.msk [vmem:[#allocation2 + $0x20] sm:$0xff] %vm208_vm0, %v2875_v61  ;;  %v651_v38 = vpop.xlane.xlu1 %650  ;;  %v672_v3 = vpop.xlane.xlu0 %671 }
 0x213   : > { %v2892_v48 = vmax.f32 %v2877_v62, %v651_v38  ;;  %v2895_v19 = vmax.f32 %v2879_v18, %v672_v3 }
 0x215   : > { %3215 = vst [vmem:[#allocation13_spill] sm:$0xff] %v2892_v48  ;;  %3216 = vst [vmem:[#allocation14_spill] sm:$0xff] %v2895_v19  ;;  %795 = vperm.xlu1 %1878, %v2853_v39  }
 0x216   : > { %1040 = vst.msk [vmem:[#allocation2 + $0x28] sm:$0xff] %vm208_vm0, %v2892_v48  ;;  %1047 = vst.msk [vmem:[#allocation2 + $0x60] sm:$0xff] %vm208_vm0, %v2895_v19  ;;  %v675_v38 = vpop.xlane.xlu1 %674  ;;  %v654_v3 = vpop.xlane.xlu0 %653 }
 0x217   : > { %v2911_v26 = vmax.f32 %v2897_v2, %v675_v38  ;;  %v2914_v8 = vmax.f32 %v2899_v47, %v654_v3  ;;  %v2936_v2 = vld [vmem:[#allocation2 + $0x78] sm:$0xff] }
 0x218   : > { %3225 = vst [vmem:[#allocation23_spill] sm:$0xff] %v2936_v2 }
 0x219   : > { %3219 = vst [vmem:[#allocation17_spill] sm:$0xff] %v2911_v26  ;;  %3220 = vst [vmem:[#allocation18_spill] sm:$0xff] %v2914_v8  ;;  %800 = vperm.xlu1 %1878, %v2875_v61   ;;  %845 = vperm.xlu0 %1877, %v2911_v26  }
 0x21a   : > { %1048 = vst.msk [vmem:[#allocation2 + $0x68] sm:$0xff] %vm208_vm0, %v2911_v26  ;;  %1041 = vst.msk [vmem:[#allocation2 + $0x30] sm:$0xff] %vm208_vm0, %v2914_v8  ;;  %v657_v3 = vpop.xlane.xlu1 %656  ;;  %v678_v29 = vpop.xlane.xlu0 %677 }
 0x21b   : > { %v2931_v62 = vmax.f32 %v2916_v27, %v657_v3  ;;  %v2934_v60 = vmax.f32 %v2918_v9, %v678_v29 }
 0x21d   : > { %3223 = vst [vmem:[#allocation21_spill] sm:$0xff] %v2931_v62  ;;  %3224 = vst [vmem:[#allocation22_spill] sm:$0xff] %v2934_v60  ;;  %840 = vperm.xlu1 %1878, %v2895_v19  }
 0x21e   : > { %1042 = vst.msk [vmem:[#allocation2 + $0x38] sm:$0xff] %vm208_vm0, %v2931_v62  ;;  %1049 = vst.msk [vmem:[#allocation2 + $0x70] sm:$0xff] %vm208_vm0, %v2934_v60  ;;  %v681_v3 = vpop.xlane.xlu1 %680 }
 0x21f   : > { %v2948_v29 = vmax.f32 %v2936_v2, %v681_v3 }
 0x221   : > { %3226 = vst [vmem:[#allocation24_spill] sm:$0xff] %v2948_v29  ;;  %1050 = vst.msk [vmem:[#allocation2 + $0x78] sm:$0xff] %vm208_vm0, %v2948_v29  ;;  %805 = vperm.xlu1 %1878, %v2892_v48   ;;  %855 = vperm.xlu0 %1877, %v2948_v29  }
 0x225   : > { %810 = vperm.xlu1 %1878, %v2914_v8  }
 0x229   : > { %815 = vperm.xlu1 %1878, %v2931_v62  }
 0x22d   : > { %850 = vperm.xlu1 %1878, %v2934_v60  }
 0x280   : > { %v781_v38 = vpop.permute.xlu0 %780 }
 0x281   : > { %v858_v3 = vsub.f32 %v2401_v28, %v781_v38  ;;  %v859_v18 = vsub.f32 %v2414_v34, %v781_v38 }
 0x283   : > { %v890_v9 = vmul.f32 1.442695, %v858_v3  ;;  %v892_v47 = vmul.f32 1.442695, %v859_v18 }
 0x284   : > { %v821_v2 = vpop.permute.xlu1 %820  ;;  %v826_v27 = vpop.permute.xlu0 %825 }
 0x285   : > { %1879 = vpow2.f32 %v890_v9  ;;  %v874_v26 = vsub.f32 %v2418_v35, %v821_v2  ;;  %v875_v29 = vsub.f32 %v2422_v36, %v821_v2  ;;  %v876_v8 = vsub.f32 %v2456_v46, %v826_v27 }
 0x286   : > { %1881 = vpow2.f32 %v892_v47  ;;  %v877_v62 = vsub.f32 %v2472_v52, %v826_v27 }
 0x287   : > { %v922_v60 = vmul.f32 1.442695, %v874_v26  ;;  %v924_v48 = vmul.f32 1.442695, %v875_v29  ;;  %v926_v19 = vmul.f32 1.442695, %v876_v8 }
 0x288   : > { %v928_v28 = vmul.f32 1.442695, %v877_v62  ;;  %v786_v61 = vpop.permute.xlu1 %785 }
 0x289   : > { %1883 = vpow2.f32 %v922_v60  ;;  %v860_v34 = vsub.f32 %v2476_v53, %v786_v61  ;;  %v861_v18 = vsub.f32 %v2480_v54, %v786_v61 }
 0x28a   : > { %1885 = vpow2.f32 %v924_v48 }
 0x28b   : > { %1887 = vpow2.f32 %v926_v19  ;;  %v894_v35 = vmul.f32 1.442695, %v860_v34  ;;  %v896_v9 = vmul.f32 1.442695, %v861_v18 }
 0x28c   : > { %1889 = vpow2.f32 %v928_v28  ;;  %v791_v36 = vpop.permute.xlu1 %790 }
 0x28d   : > { %1891 = vpow2.f32 %v894_v35  ;;  %v862_v46 = vsub.f32 %v2514_v0, %v791_v36  ;;  %v863_v52 = vsub.f32 %v2530_v10, %v791_v36 }
 0x28e   : > { %1893 = vpow2.f32 %v896_v9 }
 0x28f   : > { %v1880_v8 = vpop.eup %1879  ;;  %v898_v26 = vmul.f32 1.442695, %v862_v46  ;;  %v900_v27 = vmul.f32 1.442695, %v863_v52 }
 0x290   : > { %v1882_v60 = vpop.eup %1881  ;;  %v831_v2 = vpop.permute.xlu1 %830 }
 0x291   : > { %v836_v53 = vpop.permute.xlu0 %835  ;;  %1895 = vpow2.f32 %v898_v26  ;;  %v878_v54 = vsub.f32 %v2534_v12, %v831_v2  ;;  %v879_v47 = vsub.f32 %v2538_v13, %v831_v2  ;;  %v954_v62 = vadd.f32 %v1882_v60, %v1880_v8 }
 0x292   : > { %v880_v61 = vsub.f32 %v2592_v32, %v836_v53  ;;  %1897 = vpow2.f32 %v900_v27  ;;  %v881_v10 = vsub.f32 %v2596_v33, %v836_v53 }
 0x293   : > { %v1884_v19 = vpop.eup %1883  ;;  %v930_v0 = vmul.f32 1.442695, %v878_v54  ;;  %v932_v48 = vmul.f32 1.442695, %v879_v47  ;;  %955 = vadd.xlane.f32.xlu1 %v954_v62 }
 0x294   : > { %v1886_v38 = vpop.eup %1885  ;;  %v934_v29 = vmul.f32 1.442695, %v880_v61  ;;  %v796_v3 = vpop.permute.xlu1 %795  ;;  %v936_v35 = vmul.f32 1.442695, %v881_v10 }
 0x295   : > { %v1888_v28 = vpop.eup %1887  ;;  %1899 = vpow2.f32 %v930_v0  ;;  %v864_v34 = vsub.f32 %v2572_v23, %v796_v3  ;;  %v865_v12 = vsub.f32 %v2588_v31, %v796_v3  ;;  %v978_v13 = vadd.f32 %v1886_v38, %v1884_v19 }
 0x296   : > { %v1890_v18 = vpop.eup %1889  ;;  %1901 = vpow2.f32 %v932_v48 }
 0x297   : > { %v1892_v32 = vpop.eup %1891  ;;  %v902_v9 = vmul.f32 1.442695, %v864_v34  ;;  %v904_v36 = vmul.f32 1.442695, %v865_v12  ;;  %979 = vadd.xlane.f32.xlu0 %v978_v13  ;;  %v981_v46 = vadd.f32 %v1890_v18, %v1888_v28  ;;  %1903 = vpow2.f32 %v934_v29 }
 0x298   : > { %v1894_v33 = vpop.eup %1893  ;;  %v801_v52 = vpop.permute.xlu1 %800 }
 0x299   : > { %1905 = vpow2.f32 %v902_v9  ;;  %982 = vadd.xlane.f32.xlu1 %v981_v46  ;;  %v866_v8 = vsub.f32 %v2631_v45, %v801_v52  ;;  %v867_v23 = vsub.f32 %v2647_v51, %v801_v52  ;;  %v957_v31 = vadd.f32 %v1894_v33, %v1892_v32  ;;  %v846_v53 = vpop.permute.xlu0 %845 }
 0x29a   : > { %1907 = vpow2.f32 %v904_v36  ;;  %v884_v51 = vsub.f32 %v2706_v16, %v846_v53  ;;  %v885_v10 = vsub.f32 %v2710_v17, %v846_v53 }
 0x29b   : > { %v1896_v26 = vpop.eup %1895  ;;  %1909 = vpow2.f32 %v936_v35  ;;  %v906_v27 = vmul.f32 1.442695, %v866_v8  ;;  %v908_v60 = vmul.f32 1.442695, %v867_v23  ;;  %958 = vadd.xlane.f32.xlu0 %v957_v31 }
 0x29c   : > { %v1898_v2 = vpop.eup %1897  ;;  %v841_v54 = vpop.permute.xlu1 %840  ;;  %v942_v34 = vmul.f32 1.442695, %v884_v51  ;;  %v944_v18 = vmul.f32 1.442695, %v885_v10 }
 0x29d   : > { %1911 = vpow2.f32 %v906_v27  ;;  %v882_v47 = vsub.f32 %v2651_v55, %v841_v54  ;;  %v883_v61 = vsub.f32 %v2655_v56, %v841_v54  ;;  %v960_v62 = vadd.f32 %v1898_v2, %v1896_v26 }
 0x29e   : > { %1913 = vpow2.f32 %v908_v60 }
 0x29f   : > { %v1900_v45 = vpop.eup %1899  ;;  %v938_v19 = vmul.f32 1.442695, %v882_v47  ;;  %v940_v0 = vmul.f32 1.442695, %v883_v61  ;;  %961 = vadd.xlane.f32.xlu0 %v960_v62 }
 0x2a0   : > { %v1902_v48 = vpop.eup %1901  ;;  %v806_v38 = vpop.permute.xlu1 %805 }
 0x2a1   : > { %1915 = vpow2.f32 %v938_v19  ;;  %v868_v29 = vsub.f32 %v2687_v6, %v806_v38  ;;  %v869_v3 = vsub.f32 %v2702_v15, %v806_v38  ;;  %v1904_v55 = vpop.eup %1903  ;;  %v984_v56 = vadd.f32 %v1902_v48, %v1900_v45  ;;  %v856_v32 = vpop.permute.xlu0 %855 }
 0x2a2   : > { %1917 = vpow2.f32 %v940_v0  ;;  %v888_v46 = vsub.f32 %v2769_v43, %v856_v32  ;;  %v889_v23 = vsub.f32 %v2777_v44, %v856_v32  ;;  %v3227_v32 = vsub.f32 %v2799_v49, %v2802_v57 }
 0x2a3   : > { %v1906_v28 = vpop.eup %1905  ;;  %v910_v12 = vmul.f32 1.442695, %v868_v29  ;;  %v912_v13 = vmul.f32 1.442695, %v869_v3  ;;  %985 = vadd.xlane.f32.xlu0 %v984_v56  ;;  %v3231_v49 = vsub.f32 %v2821_v4, %v2837_v21 }
 0x2a4   : > { %v1908_v16 = vpop.eup %1907  ;;  %v811_v35 = vpop.permute.xlu1 %810  ;;  %v950_v2 = vmul.f32 1.442695, %v888_v46  ;;  %v952_v47 = vmul.f32 1.442695, %v889_v23 }
 0x2a5   : > { %v1910_v17 = vpop.eup %1909  ;;  %1919 = vpow2.f32 %v910_v12  ;;  %v870_v9 = vsub.f32 %v2737_v24, %v811_v35  ;;  %v871_v6 = vsub.f32 %v2749_v5, %v811_v35  ;;  %v963_v36 = vadd.f32 %v1908_v16, %v1906_v28 }
 0x2a6   : > { %1921 = vpow2.f32 %v912_v13  ;;  %v987_v26 = vadd.f32 %v1910_v17, %v1904_v55  ;;  %v714_v35 = vmul.f32 1.442695, %v3227_v32  ;;  %v3228_v17 = vsub.f32 %v2806_v59, %v2817_v1 }
 0x2a7   : > { %v1912_v15 = vpop.eup %1911  ;;  %1923 = vpow2.f32 %v942_v34  ;;  %v914_v33 = vmul.f32 1.442695, %v870_v9  ;;  %v916_v52 = vmul.f32 1.442695, %v871_v6  ;;  %964 = vadd.xlane.f32.xlu1 %v963_v36  ;;  %v3229_v6 = vsub.f32 %v2804_v58, %v2814_v63 }
 0x2a8   : > { %v1914_v8 = vpop.eup %1913  ;;  %1925 = vpow2.f32 %v944_v18  ;;  %v816_v31 = vpop.permute.xlu1 %815  ;;  %v730_v9 = vmul.f32 1.442695, %v3228_v17  ;;  %v718_v57 = vmul.f32 1.442695, %v3231_v49  ;;  %v3232_v59 = vsub.f32 %v2841_v25, %v2856_v40  ;;  %v3248_v17 = vld [vmem:[#allocation18_spill] sm:$0xff] }
 0x2a9   : > { %1927 = vpow2.f32 %v914_v33  ;;  %v872_v24 = vsub.f32 %v2767_v41, %v816_v31  ;;  %v873_v5 = vsub.f32 %v2775_v14, %v816_v31  ;;  %v966_v27 = vadd.f32 %v1914_v8, %v1912_v15  ;;  %v754_v8 = vld [vmem:[#allocation3 + $0x40] sm:$0xff] }
 0x2aa   : > { %1929 = vpow2.f32 %v916_v52  ;;  %v732_v36 = vmul.f32 1.442695, %v3229_v6  ;;  %v3230_v15 = vsub.f32 %v2819_v7, %v2834_v20  ;;  %v746_v52 = vld [vmem:[#allocation3] sm:$0xff]  ;;  %v734_v1 = vmul.f32 1.442695, %v3232_v59 }
 0x2ab   : > { %v1916_v60 = vpop.eup %1915  ;;  %v918_v53 = vmul.f32 1.442695, %v872_v24  ;;  %v920_v43 = vmul.f32 1.442695, %v873_v5  ;;  %967 = vadd.xlane.f32.xlu0 %v966_v27  ;;  %988 = vadd.xlane.f32.xlu1 %v987_v26  ;;  %v3233_v7 = vsub.f32 %v2839_v22, %v2853_v39  ;;  %v755_v24 = vld [vmem:[#allocation3 + $0x48] sm:$0xff]  ;;  %v3234_v25 = vsub.f32 %v2858_v42, %v2872_v50  ;;  %v3235_v22 = vld [vmem:[#allocation10_spill] sm:$0xff] }
 0x2ac   : > { %v1918_v54 = vpop.eup %1917  ;;  %v851_v61 = vpop.permute.xlu1 %850  ;;  %v716_v46 = vmul.f32 1.442695, %v3230_v15  ;;  %v3236_v39 = vsub.f32 %v2860_v11, %v3235_v22  ;;  %v748_v50 = vld [vmem:[#allocation3 + $0x10] sm:$0xff]  ;;  %v750_v59 = vld [vmem:[#allocation3 + $0x20] sm:$0xff] }
 0x2ad   : > { %1931 = vpow2.f32 %v918_v53  ;;  %v886_v44 = vsub.f32 %v2753_v30, %v851_v61  ;;  %v887_v62 = vsub.f32 %v2755_v37, %v851_v61  ;;  %v990_v45 = vadd.f32 %v1918_v54, %v1916_v60 }
 0x2ae   : > { %1933 = vpow2.f32 %v920_v43  ;;  %v720_v20 = vmul.f32 1.442695, %v3233_v7  ;;  %v736_v40 = vmul.f32 1.442695, %v3234_v25  ;;  %v722_v53 = vmul.f32 1.442695, %v3236_v39 }
 0x2af   : > { %v1920_v41 = vpop.eup %1919  ;;  %1935 = vpow2.f32 %v950_v2  ;;  %v946_v14 = vmul.f32 1.442695, %v886_v44  ;;  %v948_v51 = vmul.f32 1.442695, %v887_v62  ;;  %991 = vadd.xlane.f32.xlu0 %v990_v45  ;;  %v747_v2 = vld [vmem:[#allocation3 + $0x8] sm:$0xff]  ;;  %v3237_v44 = vld [vmem:[#allocation12_spill] sm:$0xff] }
 0x2b0   : > { %v1922_v19 = vpop.eup %1921  ;;  %1937 = vpow2.f32 %v952_v47  ;;  %v3238_v62 = vld [vmem:[#allocation14_spill] sm:$0xff] }
 0x2b1   : > { %v1924_v0 = vpop.eup %1923  ;;  %1939 = vpow2.f32 %v946_v14  ;;  %v969_v48 = vadd.f32 %v1922_v19, %v1920_v41  ;;  %v3239_v45 = vsub.f32 %v3237_v44, %v3238_v62 }
 0x2b2   : > { %v1926_v10 = vpop.eup %1925  ;;  %1941 = vpow2.f32 %v948_v51 }
 0x2b3   : > { %v1928_v38 = vpop.eup %1927  ;;  %970 = vadd.xlane.f32.xlu1 %v969_v48  ;;  %v993_v3 = vadd.f32 %v1926_v10, %v1924_v0  ;;  %1943 = vpow2.f32 %v714_v35  ;;  %v738_v41 = vmul.f32 1.442695, %v3239_v45  ;;  %v756_v48 = vld [vmem:[#allocation3 + $0x50] sm:$0xff]  ;;  %v3241_v10 = vld [vmem:[#allocation11_spill] sm:$0xff]  ;;  %v1498_v45 = vld [vmem:[#allocation2 + $0x40] sm:$0xff] }
 0x2b4   : > { %v1930_v29 = vpop.eup %1929  ;;  %1945 = vpow2.f32 %v730_v9  ;;  %v3247_v35 = vld [vmem:[#allocation16_spill] sm:$0xff] }
 0x2b5   : > { %v972_v30 = vadd.f32 %v1930_v29, %v1928_v38  ;;  %1947 = vpow2.f32 %v732_v36  ;;  %v3242_v38 = vld [vmem:[#allocation13_spill] sm:$0xff]  ;;  %v3249_v9 = vsub.f32 %v3247_v35, %v3248_v17 }
 0x2b6   : > { %1949 = vpow2.f32 %v716_v46  ;;  %v3243_v29 = vsub.f32 %v3241_v10, %v3242_v38  ;;  %v1499_v10 = vld [vmem:[#allocation2 + $0x48] sm:$0xff] }
 0x2b7   : > { %v1932_v37 = vpop.eup %1931  ;;  %973 = vadd.xlane.f32.xlu0 %v972_v30  ;;  %994 = vadd.xlane.f32.xlu1 %v993_v3  ;;  %1951 = vpow2.f32 %v718_v57  ;;  %v726_v6 = vmul.f32 1.442695, %v3249_v9 }
 0x2b8   : > { %v1934_v55 = vpop.eup %1933  ;;  %1953 = vpow2.f32 %v734_v1  ;;  %v724_v30 = vmul.f32 1.442695, %v3243_v29 }
 0x2b9   : > { %v1936_v56 = vpop.eup %1935  ;;  %v975_v28 = vadd.f32 %v1934_v55, %v1932_v37  ;;  %1955 = vpow2.f32 %v720_v20 }
 0x2ba   : > { %v1938_v34 = vpop.eup %1937  ;;  %1957 = vpow2.f32 %v736_v40  ;;  %v758_v40 = vld [vmem:[#allocation3 + $0x60] sm:$0xff] }
 0x2bb   : > { %v1940_v12 = vpop.eup %1939  ;;  %976 = vadd.xlane.f32.xlu1 %v975_v28  ;;  %v999_v18 = vadd.f32 %v1938_v34, %v1936_v56  ;;  %1959 = vpow2.f32 %v722_v53  ;;  %v749_v34 = vld [vmem:[#allocation3 + $0x18] sm:$0xff] }
 0x2bc   : > { %v1942_v13 = vpop.eup %1941 }
 0x2bd   : > { %v996_v16 = vadd.f32 %v1942_v13, %v1940_v12  ;;  %v1944_v33 = vpop.eup %1943  ;;  %v3244_v12 = vld [vmem:[#allocation15_spill] sm:$0xff]  ;;  %v3245_v13 = vld [vmem:[#allocation17_spill] sm:$0xff] }
 0x2be   : > { %v1946_v58 = vpop.eup %1945  ;;  %v762_v63 = vmul.f32 %v1944_v33, %v746_v52  ;;  %v757_v52 = vld [vmem:[#allocation3 + $0x58] sm:$0xff] }
 0x2bf   : > { %997 = vadd.xlane.f32.xlu0 %v996_v16  ;;  %1000 = vadd.xlane.f32.xlu1 %v999_v18  ;;  %v1948_v31 = vpop.eup %1947  ;;  %v770_v4 = vmul.f32 %v1946_v58, %v754_v8  ;;  %v3246_v16 = vsub.f32 %v3244_v12, %v3245_v13  ;;  %v3251_v8 = vld [vmem:[#allocation21_spill] sm:$0xff]  ;;  %v759_v13 = vld [vmem:[#allocation3 + $0x68] sm:$0xff] }
 0x2c0   : > { %v1950_v5 = vpop.eup %1949  ;;  %v771_v27 = vmul.f32 %v1948_v31, %v755_v24 }
 0x2c1   : > { %v763_v47 = vmul.f32 %v1950_v5, %v747_v2  ;;  %v1952_v61 = vpop.eup %1951  ;;  %v740_v18 = vmul.f32 1.442695, %v3246_v16  ;;  %v3254_v2 = vld [vmem:[#allocation22_spill] sm:$0xff]  ;;  %v752_v16 = vld [vmem:[#allocation3 + $0x30] sm:$0xff] }
 0x2c2   : > { %v764_v51 = vmul.f32 %v1952_v61, %v748_v50  ;;  %v1954_v19 = vpop.eup %1953  ;;  %v3257_v61 = vld [vmem:[#allocation24_spill] sm:$0xff] }
 0x2c3   : > { %v1956_v55 = vpop.eup %1955  ;;  %v772_v28 = vmul.f32 %v1954_v19, %v756_v48  ;;  %v751_v48 = vld [vmem:[#allocation3 + $0x28] sm:$0xff] }
 0x2c4   : > { %v1958_v15 = vpop.eup %1957  ;;  %v765_v49 = vmul.f32 %v1956_v55, %v749_v34  ;;  %v1491_v34 = vld [vmem:[#allocation2 + $0x8] sm:$0xff] }
 0x2c5   : > { %v1960_v57 = vpop.eup %1959 }
 0x2c6   : > { %v766_v24 = vmul.f32 %v1960_v57, %v750_v59 }
 0x320   : > { %v956_v23 = vpop.xlane.xlu1 %955 }
 0x321   : > { %v1002_v26 = vadd.f32 %v956_v23, %v762_v63  ;;  %v3250_v63 = vld [vmem:[#allocation19_spill] sm:$0xff] }
 0x322   : > { %v3252_v23 = vsub.f32 %v3250_v63, %v3251_v8 }
 0x323   : > { %1019 = vst.msk [vmem:[#allocation3] sm:$0xff] %vm208_vm0, %v1002_v26  ;;  %v773_v26 = vmul.f32 %v1958_v15, %v757_v52  ;;  %v753_v52 = vld [vmem:[#allocation3 + $0x38] sm:$0xff] }
 0x324   : > { %v980_v21 = vpop.xlane.xlu0 %979  ;;  %v728_v31 = vmul.f32 1.442695, %v3252_v23 }
 0x325   : > { %v1010_v60 = vadd.f32 %v980_v21, %v770_v4  ;;  %v1490_v21 = vld [vmem:[#allocation2] sm:$0xff] }
 0x326   : > { %v983_v43 = vpop.xlane.xlu1 %982 }
 0x327   : > { %v1011_v54 = vadd.f32 %v983_v43, %v771_v27  ;;  %1027 = vst.msk [vmem:[#allocation3 + $0x40] sm:$0xff] %vm208_vm0, %v1010_v60  ;;  %v3253_v60 = vld [vmem:[#allocation20_spill] sm:$0xff] }
 0x328   : > { %v959_v42 = vpop.xlane.xlu0 %958  ;;  %v3255_v22 = vsub.f32 %v3253_v60, %v3254_v2  ;;  %v1493_v2 = vld [vmem:[#allocation2 + $0x18] sm:$0xff] }
 0x329   : > { %1028 = vst.msk [vmem:[#allocation3 + $0x48] sm:$0xff] %vm208_vm0, %v1011_v54  ;;  %v1003_v14 = vadd.f32 %v959_v42, %v763_v47  ;;  %v3256_v47 = vld [vmem:[#allocation23_spill] sm:$0xff] }
 0x32a   : > { %v1506_v11 = vld [vmem:[#allocation3] sm:$0xff]  ;;  %v742_v39 = vmul.f32 1.442695, %v3255_v22  ;;  %v3258_v42 = vsub.f32 %v3256_v47, %v3257_v61 }
 0x32b   : > { %1961 = vlog2.f32 %v1506_v11  ;;  %1020 = vst.msk [vmem:[#allocation3 + $0x8] sm:$0xff] %vm208_vm0, %v1003_v14 }
 0x32c   : > { %v962_v0 = vpop.xlane.xlu0 %961  ;;  %1963 = vpow2.f32 %v738_v41  ;;  %v744_v50 = vmul.f32 1.442695, %v3258_v42 }
 0x32d   : > { %v1004_v37 = vadd.f32 %v962_v0, %v764_v51 }
 0x32e   : > { %v1514_v3 = vld [vmem:[#allocation3 + $0x40] sm:$0xff] }
 0x32f   : > { %1965 = vlog2.f32 %v1514_v3  ;;  %1021 = vst.msk [vmem:[#allocation3 + $0x10] sm:$0xff] %vm208_vm0, %v1004_v37 }
 0x330   : > { %v1515_v56 = vld [vmem:[#allocation3 + $0x48] sm:$0xff]  ;;  %v986_v32 = vpop.xlane.xlu0 %985 }
 0x331   : > { %1967 = vlog2.f32 %v1515_v56  ;;  %v1012_v36 = vadd.f32 %v986_v32, %v772_v28 }
 0x332   : > { %1969 = vpow2.f32 %v724_v30  ;;  %v1507_v46 = vld [vmem:[#allocation3 + $0x8] sm:$0xff] }
 0x333   : > { %1971 = vlog2.f32 %v1507_v46  ;;  %1029 = vst.msk [vmem:[#allocation3 + $0x50] sm:$0xff] %vm208_vm0, %v1012_v36 }
 0x334   : > { %v965_v33 = vpop.xlane.xlu1 %964  ;;  %1973 = vpow2.f32 %v740_v18 }
 0x335   : > { %v1005_v1 = vadd.f32 %v965_v33, %v765_v49  ;;  %v1962_v58 = vpop.eup %1961  ;;  %1975 = vpow2.f32 %v726_v6  ;;  %v1492_v49 = vld [vmem:[#allocation2 + $0x10] sm:$0xff] }
 0x336   : > { %v1523_v7 = vmul.f32 0.6931472, %v1962_v58  ;;  %v1508_v20 = vld [vmem:[#allocation3 + $0x10] sm:$0xff]  ;;  %v1964_v4 = vpop.eup %1963 }
 0x337   : > { %1022 = vst.msk [vmem:[#allocation3 + $0x18] sm:$0xff] %vm208_vm0, %v1005_v1  ;;  %1977 = vlog2.f32 %v1508_v20  ;;  %v774_v14 = vmul.f32 %v1964_v4, %v758_v40  ;;  %v761_v4 = vld [vmem:[#allocation3 + $0x78] sm:$0xff] }
 0x338   : > { %v989_v5 = vpop.xlane.xlu1 %988  ;;  %v968_v25 = vpop.xlane.xlu0 %967  ;;  %v1554_v53 = vadd.f32 %v1523_v7, %v1490_v21  ;;  %1979 = vpow2.f32 %v728_v31  ;;  %v760_v21 = vld [vmem:[#allocation3 + $0x70] sm:$0xff] }
 0x339   : > { %v1966_v27 = vpop.eup %1965  ;;  %v1013_v43 = vadd.f32 %v989_v5, %v773_v26  ;;  %v1006_v54 = vadd.f32 %v968_v25, %v766_v24  ;;  %v1500_v26 = vld [vmem:[#allocation2 + $0x50] sm:$0xff] }
 0x33a   : > { %v1539_v44 = vmul.f32 0.6931472, %v1966_v27  ;;  %1571 = vst.msk [vmem:[%s3053_s20] sm:$0xff] %vm208_vm0, %v1554_v53  ;;  %v1516_v41 = vld [vmem:[#allocation3 + $0x50] sm:$0xff] }
 0x33b   : > { %v1968_v62 = vpop.eup %1967  ;;  %1030 = vst.msk [vmem:[#allocation3 + $0x58] sm:$0xff] %vm208_vm0, %v1013_v43  ;;  %1023 = vst.msk [vmem:[#allocation3 + $0x20] sm:$0xff] %vm208_vm0, %v1006_v54  ;;  %1981 = vlog2.f32 %v1516_v41  ;;  %v1501_v41 = vld [vmem:[#allocation2 + $0x58] sm:$0xff] }
 0x33c   : > { %v1970_v11 = vpop.eup %1969  ;;  %v1541_v51 = vmul.f32 0.6931472, %v1968_v62  ;;  %v1562_v19 = vadd.f32 %v1539_v44, %v1498_v45  ;;  %v992_v0 = vpop.xlane.xlu0 %991  ;;  %1983 = vpow2.f32 %v742_v39 }
 0x33d   : > { %v1014_v38 = vadd.f32 %v992_v0, %v774_v14  ;;  %v1972_v29 = vpop.eup %1971  ;;  %1985 = vpow2.f32 %v744_v50  ;;  %v767_v56 = vmul.f32 %v1970_v11, %v751_v48  ;;  %v1494_v11 = vld [vmem:[#allocation2 + $0x20] sm:$0xff] }
 0x33e   : > { %v1563_v30 = vadd.f32 %v1541_v51, %v1499_v10  ;;  %1579 = vst.msk [vmem:[%s3053_s20 + $0x40] sm:$0xff] %vm208_vm0, %v1562_v19  ;;  %v1509_v3 = vld [vmem:[#allocation3 + $0x18] sm:$0xff]  ;;  %v1974_v37 = vpop.eup %1973  ;;  %v1525_v55 = vmul.f32 0.6931472, %v1972_v29 }
 0x33f   : > { %1987 = vlog2.f32 %v1509_v3  ;;  %1031 = vst.msk [vmem:[#allocation3 + $0x60] sm:$0xff] %vm208_vm0, %v1014_v38  ;;  %v1976_v28 = vpop.eup %1975  ;;  %v775_v36 = vmul.f32 %v1974_v37, %v759_v13  ;;  %v1502_v38 = vld [vmem:[#allocation2 + $0x60] sm:$0xff] }
 0x340   : > { %1580 = vst.msk [vmem:[%s3053_s20 + $0x48] sm:$0xff] %vm208_vm0, %v1563_v30  ;;  %v971_v12 = vpop.xlane.xlu1 %970  ;;  %v1555_v18 = vadd.f32 %v1525_v55, %v1491_v34  ;;  %v768_v15 = vmul.f32 %v1976_v28, %v752_v16  ;;  %v1503_v16 = vld [vmem:[#allocation2 + $0x68] sm:$0xff] }
 0x341   : > { %v1007_v32 = vadd.f32 %v971_v12, %v767_v56  ;;  %v1978_v35 = vpop.eup %1977  ;;  %v1495_v56 = vld [vmem:[#allocation2 + $0x28] sm:$0xff] }
 0x342   : > { %v1517_v17 = vld [vmem:[#allocation3 + $0x58] sm:$0xff]  ;;  %v1510_v9 = vld [vmem:[#allocation3 + $0x20] sm:$0xff]  ;;  %1572 = vst.msk [vmem:[%s3053_s20 + $0x8] sm:$0xff] %vm208_vm0, %v1555_v18  ;;  %v1527_v6 = vmul.f32 0.6931472, %v1978_v35  ;;  %v1980_v46 = vpop.eup %1979 }
 0x343   : > { %1989 = vlog2.f32 %v1517_v17  ;;  %1024 = vst.msk [vmem:[#allocation3 + $0x28] sm:$0xff] %vm208_vm0, %v1007_v32  ;;  %v769_v7 = vmul.f32 %v1980_v46, %v753_v52  ;;  %v1496_v32 = vld [vmem:[#allocation2 + $0x30] sm:$0xff] }
 0x344   : > { %1991 = vlog2.f32 %v1510_v9  ;;  %v995_v57 = vpop.xlane.xlu1 %994  ;;  %v974_v33 = vpop.xlane.xlu0 %973  ;;  %v1556_v59 = vadd.f32 %v1527_v6, %v1492_v49 }
 0x345   : > { %v1015_v1 = vadd.f32 %v995_v57, %v775_v36  ;;  %v1008_v58 = vadd.f32 %v974_v33, %v768_v15  ;;  %v1982_v63 = vpop.eup %1981  ;;  %v1497_v36 = vld [vmem:[#allocation2 + $0x38] sm:$0xff] }
 0x346   : > { %v1518_v8 = vld [vmem:[#allocation3 + $0x60] sm:$0xff]  ;;  %v1984_v23 = vpop.eup %1983  ;;  %1573 = vst.msk [vmem:[%s3053_s20 + $0x10] sm:$0xff] %vm208_vm0, %v1556_v59  ;;  %v1543_v31 = vmul.f32 0.6931472, %v1982_v63  ;;  %v1505_v33 = vld [vmem:[#allocation2 + $0x78] sm:$0xff]  ;;  %v1504_v59 = vld [vmem:[#allocation2 + $0x70] sm:$0xff] }
 0x347   : > { %1993 = vlog2.f32 %v1518_v8  ;;  %1032 = vst.msk [vmem:[#allocation3 + $0x68] sm:$0xff] %vm208_vm0, %v1015_v1  ;;  %1025 = vst.msk [vmem:[#allocation3 + $0x30] sm:$0xff] %vm208_vm0, %v1008_v58  ;;  %v1986_v20 = vpop.eup %1985  ;;  %v776_v39 = vmul.f32 %v1984_v23, %v760_v21 }
 0x348   : > { %v977_v24 = vpop.xlane.xlu1 %976  ;;  %v1564_v25 = vadd.f32 %v1543_v31, %v1500_v26  ;;  %v777_v22 = vmul.f32 %v1986_v20, %v761_v4 }
 0x349   : > { %v1988_v5 = vpop.eup %1987  ;;  %v1009_v40 = vadd.f32 %v977_v24, %v769_v7 }
 0x34a   : > { %v1529_v27 = vmul.f32 0.6931472, %v1988_v5  ;;  %v1511_v60 = vld [vmem:[#allocation3 + $0x28] sm:$0xff]  ;;  %1581 = vst.msk [vmem:[%s3053_s20 + $0x50] sm:$0xff] %vm208_vm0, %v1564_v25 }
 0x34b   : > { %1995 = vlog2.f32 %v1511_v60  ;;  %1026 = vst.msk [vmem:[#allocation3 + $0x38] sm:$0xff] %vm208_vm0, %v1009_v40 }
 0x34c   : > { %v1557_v53 = vadd.f32 %v1529_v27, %v1493_v2  ;;  %v1001_v43 = vpop.xlane.xlu1 %1000  ;;  %v998_v54 = vpop.xlane.xlu0 %997 }
 0x34d   : > { %v1990_v47 = vpop.eup %1989  ;;  %v1017_v61 = vadd.f32 %v1001_v43, %v777_v22  ;;  %v1016_v42 = vadd.f32 %v998_v54, %v776_v39 }
 0x34e   : > { %v1992_v50 = vpop.eup %1991  ;;  %1574 = vst.msk [vmem:[%s3053_s20 + $0x18] sm:$0xff] %vm208_vm0, %v1557_v53  ;;  %v1545_v44 = vmul.f32 0.6931472, %v1990_v47  ;;  %v1519_v62 = vld [vmem:[#allocation3 + $0x68] sm:$0xff]  ;;  %v1512_v45 = vld [vmem:[#allocation3 + $0x30] sm:$0xff] }
 0x34f   : > { %v1531_v14 = vmul.f32 0.6931472, %v1992_v50  ;;  %1997 = vlog2.f32 %v1519_v62  ;;  %1034 = vst.msk [vmem:[#allocation3 + $0x78] sm:$0xff] %vm208_vm0, %v1017_v61  ;;  %1033 = vst.msk [vmem:[#allocation3 + $0x70] sm:$0xff] %vm208_vm0, %v1016_v42 }
 0x350   : > { %v1565_v51 = vadd.f32 %v1545_v44, %v1501_v41  ;;  %1999 = vlog2.f32 %v1512_v45 }
 0x351   : > { %v1994_v19 = vpop.eup %1993  ;;  %v1558_v0 = vadd.f32 %v1531_v14, %v1494_v11 }
 0x352   : > { %1582 = vst.msk [vmem:[%s3053_s20 + $0x58] sm:$0xff] %vm208_vm0, %v1565_v51  ;;  %v1547_v48 = vmul.f32 0.6931472, %v1994_v19  ;;  %v1513_v10 = vld [vmem:[#allocation3 + $0x38] sm:$0xff] }
 0x353   : > { %1575 = vst.msk [vmem:[%s3053_s20 + $0x20] sm:$0xff] %vm208_vm0, %v1558_v0  ;;  %2001 = vlog2.f32 %v1513_v10 }
 0x354   : > { %v1566_v29 = vadd.f32 %v1547_v48, %v1502_v38 }
 0x355   : > { %v1996_v30 = vpop.eup %1995 }
 0x356   : > { %1583 = vst.msk [vmem:[%s3053_s20 + $0x60] sm:$0xff] %vm208_vm0, %v1566_v29  ;;  %v1533_v3 = vmul.f32 0.6931472, %v1996_v30  ;;  %v1521_v37 = vld [vmem:[#allocation3 + $0x78] sm:$0xff]  ;;  %v1520_v55 = vld [vmem:[#allocation3 + $0x70] sm:$0xff] }
 0x357   : > { %2003 = vlog2.f32 %v1521_v37 }
 0x358   : > { %v1559_v28 = vadd.f32 %v1533_v3, %v1495_v56  ;;  %2005 = vlog2.f32 %v1520_v55 }
 0x359   : > { %v1998_v34 = vpop.eup %1997 }
 0x35a   : > { %v2000_v12 = vpop.eup %1999  ;;  %1576 = vst.msk [vmem:[%s3053_s20 + $0x28] sm:$0xff] %vm208_vm0, %v1559_v28  ;;  %v1549_v13 = vmul.f32 0.6931472, %v1998_v34 }
 0x35b   : > { %v1535_v18 = vmul.f32 0.6931472, %v2000_v12 }
 0x35c   : > { %v1567_v35 = vadd.f32 %v1549_v13, %v1503_v16 }
 0x35d   : > { %v2002_v17 = vpop.eup %2001  ;;  %v1560_v9 = vadd.f32 %v1535_v18, %v1496_v32 }
 0x35e   : > { %1584 = vst.msk [vmem:[%s3053_s20 + $0x68] sm:$0xff] %vm208_vm0, %v1567_v35  ;;  %v1537_v6 = vmul.f32 0.6931472, %v2002_v17 }
 0x35f   : > { %1577 = vst.msk [vmem:[%s3053_s20 + $0x30] sm:$0xff] %vm208_vm0, %v1560_v9 }
 0x360   : > { %v1561_v15 = vadd.f32 %v1537_v6, %v1497_v36 }
 0x361   : > { %v2004_v46 = vpop.eup %2003 }
 0x362   : > { %v2006_v49 = vpop.eup %2005  ;;  %1578 = vst.msk [vmem:[%s3053_s20 + $0x38] sm:$0xff] %vm208_vm0, %v1561_v15  ;;  %v1553_v57 = vmul.f32 0.6931472, %v2004_v46 }
 0x363   : > { %v1551_v52 = vmul.f32 0.6931472, %v2006_v49 }
 0x364   : > { %v1569_v1 = vadd.f32 %v1553_v57, %v1505_v33 }
 0x365   : > { %v1568_v58 = vadd.f32 %v1551_v52, %v1504_v59 }
 0x366   : > { %1586 = vst.msk [vmem:[%s3053_s20 + $0x78] sm:$0xff] %vm208_vm0, %v1569_v1 }
 0x367   : > { %1585 = vst.msk [vmem:[%s3053_s20 + $0x70] sm:$0xff] %vm208_vm0, %v1568_v58 }
 0x368 PF: > { %s16_s14 = sadd.s32 1, %s2119_s14   ;;  %s3259_s9 = smov %s2103_s10 }
 0x369   : > { %p13_p1 = scmp.ge.s32.totalorder %s16_s14, 4   ;;  %s3260_s10 = smov %s2107_s11 }
 0x36a   : > { %s3261_s11 = smov %s2230_s21  ;;  %s3262_s12 = smov %s2115_s13 }
 0x36b   : > { %s3263_s13 = smov %s3265_s22  ;;  %15 = sbr.rel (!%p13_p1) target bundleno = 5 (0x5), region = 89 }
 0x372   :  { %1609 = vsyncpa [#allocation5], 1 }
 0x373   :  { %1611 = vsyncpa [#allocation5 + $0x1], 1 }
 0x374   :  { %1612 = vsyncpa [#allocation7], 1 }

</bundles_post_ra>
